<compile_context>
chip_gen: v5e
topology: v5e:2x2
jax: 0.10.0
libtpu: 0.0.40
codegen_flags: <defaults>
</compile_context>

<pallas_src>
import functools

import jax
import jax.numpy as jnp
from jax.experimental import pallas as pl
from jax.experimental.pallas import tpu as pltpu

HID1 = 16                    # GCNConv out channels
HEADS = 8                    # GATConv heads
HID2 = 16                    # GATConv per-head out channels
JUMP = HID1 + HEADS * HID2   # 16 + 128 = 144 (JumpingKnowledge 'cat')
FC1 = 16


def _vmem_specs(n):
    return [pl.BlockSpec(memory_space=pltpu.MemorySpace.VMEM) for _ in range(n)]


# ----------------------------- fused kernel ----------------------------------
def fused_gcn_gat_pool_kernel(adj_ref, x_ref, gcn_w_ref, gcn_b_ref,
                              gat_w_ref, att_ref, gat_b_ref,
                              pool_ref, fc1_w1_ref, fc1_w2_ref, fc1_b_ref,
                              fc2_w_ref, fc2_b_ref, out_ref, *, score_dtype):
    adj = adj_ref[...]                      # bf16 [N,N] GCN-normalized, self loops included
    mask = adj > 0                          # attention mask; self loops keep the diag > 0
    n = adj.shape[0]

    # ---- GCNConv: x1 = relu( norm_adj @ (x @ W) + b ) ----
    xw = jnp.dot(x_ref[...], gcn_w_ref[...], preferred_element_type=jnp.float32)     # [N,16]
    agg = jnp.dot(adj, xw.astype(jnp.bfloat16), preferred_element_type=jnp.float32)
    x1 = jnp.maximum(agg + gcn_b_ref[...], 0.0)                                      # [N,16] f32

    # ---- GAT prologue (all heads at once) ----
    z = jnp.dot(x1, gat_w_ref[...], preferred_element_type=jnp.float32)              # [N,128]
    a = jnp.dot(z, att_ref[...], preferred_element_type=jnp.float32)                 # [N,16]
    a_src = a[:, :HEADS]                                                             # [N,8]
    a_dst = a[:, HEADS:]                                                             # [N,8]
    # Monotone upper bound of each row max: LeakyReLU is monotone, so
    # LeakyReLU(a_dst_i + max_j a_src_j) >= max_j LeakyReLU(a_dst_i + a_src_j).
    src_max = jnp.max(a_src, axis=0, keepdims=True)                                  # [1,8]
    m = a_dst + src_max
    m = jnp.where(m > 0.0, m, 0.2 * m)                                               # [N,8]
    a_src_t = a_src.T                                                                # [8,N] one vxpose

    z_bf = z.astype(jnp.bfloat16)
    a_dst_c = a_dst.astype(score_dtype)
    a_src_t_c = a_src_t.astype(score_dtype)
    m_c = m.astype(score_dtype)
    neg_big = jnp.array(-1e30, dtype=score_dtype)
    ones_col = jnp.ones((n, 1), jnp.bfloat16)

    pool = pool_ref[...]                                                             # [G,N]
    gat_b = gat_b_ref[...]                                                           # [1,128]
    fc1_w2 = fc1_w2_ref[...]                                                         # [128,16]

    # ---- fc1 accumulator, x1 part of the JK 'cat' (K dim split 16 + 128) ----
    pooled1 = jnp.dot(pool, x1, preferred_element_type=jnp.float32)                  # [G,16]
    h1 = (jnp.dot(pooled1, fc1_w1_ref[...], preferred_element_type=jnp.float32)
          + fc1_b_ref[...])

    # ---- GAT heads: softmax + value matmul, pooled and folded into fc1 ----
    # Each head's [N,N] e/p temporaries feed only that head's dots before the
    # next head starts, so only one head's [N,N] temps are live at a time.
    # TODO(synk): at large N switch to lax.fori_loop over heads with VMEM scratch
    # and a row-tiled "parallel" grid (needs a 2-call split since every head
    # needs z for all source nodes); whole-array residency is fine at these sizes.
    for h in range(HEADS):
        lo, hi = h * HID2, (h + 1) * HID2
        e = a_dst_c[:, h:h + 1] + a_src_t_c[h:h + 1, :]      # e[i,j] = a_dst[i] + a_src[j]
        e = jnp.where(e > 0, e, 0.2 * e)                     # LeakyReLU(0.2)
        e = jnp.where(mask, e - m_c[:, h:h + 1], neg_big)    # shift by bound + mask fill
        p = jnp.exp(e).astype(jnp.bfloat16)                  # masked entries underflow to 0
        num = jnp.dot(p, z_bf[:, lo:hi], preferred_element_type=jnp.float32)   # [N,16]
        den = jnp.dot(p, ones_col, preferred_element_type=jnp.float32)         # [N,1] on MXU
        inv = pl.reciprocal(jnp.maximum(den, 1e-30), approx=True)
        x2_h = jnp.maximum(num * inv + gat_b[:, lo:hi], 0.0)                   # [N,16]
        pooled2_h = jnp.dot(pool, x2_h, preferred_element_type=jnp.float32)    # [G,16]
        h1 = h1 + jnp.dot(pooled2_h, fc1_w2[lo:hi, :],
                          preferred_element_type=jnp.float32)

    # ---- fc1 relu + fc2 ----
    h1 = jnp.maximum(h1, 0.0)
    out_ref[...] = (jnp.dot(h1, fc2_w_ref[...], preferred_element_type=jnp.float32)
                    + fc2_b_ref[...])


# ------------------------------ model ----------------------------------------
def init_params(key, num_node_features):
    ks = jax.random.split(key, 8)

    def glorot(k, shape):
        lim = jnp.sqrt(6.0 / (shape[0] + shape[-1]))
        return jax.random.uniform(k, shape, jnp.float32, -lim, lim)

    return dict(
        gcn_w=glorot(ks[0], (num_node_features, HID1)),
        gcn_b=jnp.zeros((1, HID1), jnp.float32),
        gat_w=glorot(ks[1], (HID1, HEADS * HID2)),
        gat_att_src=glorot(ks[2], (HID2, HEADS)),   # column h = att_src vector of head h
        gat_att_dst=glorot(ks[3], (HID2, HEADS)),
        gat_b=jnp.zeros((1, HEADS * HID2), jnp.float32),
        fc1_w=glorot(ks[4], (JUMP, FC1)),
        fc1_b=jax.random.uniform(ks[5], (1, FC1), jnp.float32, -0.1, 0.1),
        fc2_w=glorot(ks[6], (FC1, 1)),
        fc2_b=jax.random.uniform(ks[7], (1, 1), jnp.float32, -0.1, 0.1),
    )


def _block_diag_att(att):
    # att: [HID2, HEADS] -> block-diagonal [HEADS*HID2, HEADS];
    # column h holds att[:, h] in rows h*HID2:(h+1)*HID2.
    return (att.T[:, :, None] * jnp.eye(HEADS, dtype=att.dtype)[:, None, :]
            ).reshape(HEADS * HID2, HEADS)


def _device_kind():
    try:
        return jax.devices()[0].device_kind.lower()
    except Exception:
        return ""


def _vmem_limit_bytes(n, kind):
    # Per-generation ceilings: v7x has only 64 MiB VMEM, v5e/v6e have 128 MiB.
    cap = (56 << 20) if "v7" in kind else (100 << 20)
    score_bytes = 2 if ("v6" in kind or "v7" in kind) else 4
    need = (2 * n * n                 # bf16 adjacency
            + 4 * n * n               # mask / misc
            + 3 * score_bytes * n * n # live e/p temporaries of one head
            + 4 * n * 256             # x, x1, z, pool, small operands
            + (4 << 20))              # slack for compiler temporaries
    return int(min(cap, max(need, 16 << 20)))


@functools.partial(jax.jit, static_argnames=("num_graphs",))
def enhanced_gcn_forward(params, x, edge_index, batch, num_graphs):
    n = x.shape[0]
    src, dst = edge_index[0], edge_index[1]

    # Dense adjacency with self loops (graph-structure glue, not the hot path).
    adj = jnp.zeros((n, n), jnp.float32).at[dst, src].add(1.0)
    adj_sl = adj + jnp.eye(n, dtype=jnp.float32)
    deg = jnp.sum(adj_sl, axis=1)
    dinv = jnp.where(deg > 0, jax.lax.rsqrt(deg), 0.0)
    # bf16 halves HBM traffic for the dominant [N,N] operand; the attention mask
    # is recovered in-kernel as norm_adj > 0 (self loops keep the diagonal > 0).
    norm_adj = (adj_sl * dinv[:, None] * dinv[None, :]).astype(jnp.bfloat16)
    # TODO(synk): the dense mask collapses duplicate edges into one attention
    # logit, whereas PyG GATConv softmaxes over the edge multiset; GCN
    # normalization counts duplicates, matching PyG.

    # mean-pool matrix [G, N]
    graph_ids = jnp.arange(num_graphs)
    onehot = (batch[None, :] == graph_ids[:, None]).astype(jnp.float32)
    counts = jnp.maximum(jnp.sum(onehot, axis=1, keepdims=True), 1.0)
    pool = onehot / counts

    # att_src | att_dst fused into one [128, 16] matrix -> single z @ att matmul.
    att_combined = jnp.concatenate(
        [_block_diag_att(params["gat_att_src"]),
         _block_diag_att(params["gat_att_dst"])], axis=1)
    fc1_w1 = params["fc1_w"][:HID1]     # [16, 16]  (x1 part of JK 'cat')
    fc1_w2 = params["fc1_w"][HID1:]     # [128, 16] (x2 part)

    kind = _device_kind()
    # bf16 score chain on bf16-native VPU/EUP generations; f32 on v5e (no bf16 VPU).
    score_dtype = jnp.bfloat16 if ("v6" in kind or "v7" in kind) else jnp.float32

    # TODO(synk): for large N, split into a row-tiled "parallel"-grid GCN/z pass
    # plus a row-tiled GAT+pool pass so v7x's second TensorCore is used and the
    # [N,N] adjacency DMA pipelines under compute; single-call residency is the
    # right choice at these sizes.
    out = pl.pallas_call(
        functools.partial(fused_gcn_gat_pool_kernel, score_dtype=score_dtype),
        out_shape=jax.ShapeDtypeStruct((num_graphs, 1), jnp.float32),
        in_specs=_vmem_specs(13),
        out_specs=pl.BlockSpec(memory_space=pltpu.MemorySpace.VMEM),
        compiler_params=pltpu.CompilerParams(
            vmem_limit_bytes=_vmem_limit_bytes(n, kind)),
    )(norm_adj, x, params["gcn_w"], params["gcn_b"],
      params["gat_w"], att_combined, params["gat_b"],
      pool, fc1_w1, fc1_w2, params["fc1_b"],
      params["fc2_w"], params["fc2_b"])
    return out[:, 0]                                     # .flatten()


if __name__ == "__main__":
    key = jax.random.PRNGKey(0)
    k_x, k_e, k_p = jax.random.split(key, 3)

    num_nodes = 16
    num_node_features = 4
    num_edges = 40
    num_graphs = 2

    x = jax.random.normal(k_x, (num_nodes, num_node_features), jnp.float32)
    edge_index = jax.random.randint(k_e, (2, num_edges), 0, num_nodes, jnp.int32)
    batch = jnp.concatenate([jnp.zeros(8, jnp.int32), jnp.ones(8, jnp.int32)])

    params = init_params(k_p, num_node_features)

    out = enhanced_gcn_forward(params, x, edge_index, batch, num_graphs)
    jax.block_until_ready(out)
    assert out.shape == (num_graphs,)
    print("KERNEL_OK")
</pallas_src>

<mosaic_0001>
module attributes {stable_mosaic.version = 11 : i64} {
  func.func @fused_gcn_gat_pool_kernel(%arg0: memref<16x16xbf16, #tpu.memory_space<vmem>>, %arg1: memref<16x4xf32, #tpu.memory_space<vmem>>, %arg2: memref<4x16xf32, #tpu.memory_space<vmem>>, %arg3: memref<1x16xf32, #tpu.memory_space<vmem>>, %arg4: memref<16x128xf32, #tpu.memory_space<vmem>>, %arg5: memref<128x16xf32, #tpu.memory_space<vmem>>, %arg6: memref<1x128xf32, #tpu.memory_space<vmem>>, %arg7: memref<2x16xf32, #tpu.memory_space<vmem>>, %arg8: memref<16x16xf32, #tpu.memory_space<vmem>>, %arg9: memref<128x16xf32, #tpu.memory_space<vmem>>, %arg10: memref<1x16xf32, #tpu.memory_space<vmem>>, %arg11: memref<16x1xf32, #tpu.memory_space<vmem>>, %arg12: memref<1x1xf32, #tpu.memory_space<vmem>>, %arg13: memref<2x1xf32, #tpu.memory_space<vmem>>) attributes {dimension_semantics = [], scalar_prefetch = 0 : i64, scratch_operands = 0 : i64, tpu.core_type = #tpu.core_type<tc>} {
    %c0 = arith.constant 0 : index
    %c0_0 = arith.constant 0 : index
    %0 = vector.load %arg0[%c0, %c0_0] : memref<16x16xbf16, #tpu.memory_space<vmem>>, vector<16x16xbf16>
    %cst = arith.constant 0.000000e+00 : bf16
    %1 = vector.broadcast %cst : bf16 to vector<16x16xbf16>
    %2 = arith.cmpf ogt, %0, %1 : vector<16x16xbf16>
    %c0_1 = arith.constant 0 : index
    %c0_2 = arith.constant 0 : index
    %3 = vector.load %arg1[%c0_1, %c0_2] : memref<16x4xf32, #tpu.memory_space<vmem>>, vector<16x4xf32>
    %c0_3 = arith.constant 0 : index
    %c0_4 = arith.constant 0 : index
    %4 = vector.load %arg2[%c0_3, %c0_4] : memref<4x16xf32, #tpu.memory_space<vmem>>, vector<4x16xf32>
    %cst_5 = arith.constant dense<0.000000e+00> : vector<16x16xf32>
    %5 = tpu.matmul %3, %4, %cst_5 {dimension_numbers = #tpu.dot_dimension_numbers<[1], [0], [0], [1], [0, 0, 1, 1], [], []>} : vector<16x4xf32>, vector<4x16xf32>, vector<16x16xf32> -> vector<16x16xf32>
    %6 = arith.truncf %5 : vector<16x16xf32> to vector<16x16xbf16>
    %cst_6 = arith.constant dense<0.000000e+00> : vector<16x16xf32>
    %7 = tpu.matmul %0, %6, %cst_6 {dimension_numbers = #tpu.dot_dimension_numbers<[1], [0], [0], [1], [0, 0, 1, 1], [], []>} : vector<16x16xbf16>, vector<16x16xbf16>, vector<16x16xf32> -> vector<16x16xf32>
    %c0_7 = arith.constant 0 : index
    %c0_8 = arith.constant 0 : index
    %8 = vector.load %arg3[%c0_7, %c0_8] : memref<1x16xf32, #tpu.memory_space<vmem>>, vector<1x16xf32>
    %9 = vector.broadcast %8 : vector<1x16xf32> to vector<16x16xf32>
    %10 = arith.addf %7, %9 : vector<16x16xf32>
    %cst_9 = arith.constant 0.000000e+00 : f32
    %11 = vector.broadcast %cst_9 : f32 to vector<16x16xf32>
    %12 = arith.maximumf %10, %11 : vector<16x16xf32>
    %c0_10 = arith.constant 0 : index
    %c0_11 = arith.constant 0 : index
    %13 = vector.load %arg4[%c0_10, %c0_11] : memref<16x128xf32, #tpu.memory_space<vmem>>, vector<16x128xf32>
    %cst_12 = arith.constant dense<0.000000e+00> : vector<16x128xf32>
    %14 = tpu.matmul %12, %13, %cst_12 {dimension_numbers = #tpu.dot_dimension_numbers<[1], [0], [0], [1], [0, 0, 1, 1], [], []>} : vector<16x16xf32>, vector<16x128xf32>, vector<16x128xf32> -> vector<16x128xf32>
    %c0_13 = arith.constant 0 : index
    %c0_14 = arith.constant 0 : index
    %15 = vector.load %arg5[%c0_13, %c0_14] : memref<128x16xf32, #tpu.memory_space<vmem>>, vector<128x16xf32>
    %cst_15 = arith.constant dense<0.000000e+00> : vector<16x16xf32>
    %16 = tpu.matmul %14, %15, %cst_15 {dimension_numbers = #tpu.dot_dimension_numbers<[1], [0], [0], [1], [0, 0, 1, 1], [], []>} : vector<16x128xf32>, vector<128x16xf32>, vector<16x16xf32> -> vector<16x16xf32>
    %17 = vector.extract_strided_slice %16 {offsets = [0, 0], sizes = [16, 8], strides = [1, 1]} : vector<16x16xf32> to vector<16x8xf32>
    %18 = vector.extract_strided_slice %16 {offsets = [0, 8], sizes = [16, 8], strides = [1, 1]} : vector<16x16xf32> to vector<16x8xf32>
    %cst_16 = arith.constant dense<0xFF800000> : vector<8xf32>
    %19 = vector.multi_reduction <maximumf>, %17, %cst_16 [0] : vector<16x8xf32> to vector<8xf32>
    %20 = vector.shape_cast %19 : vector<8xf32> to vector<1x8xf32>
    %21 = vector.broadcast %20 : vector<1x8xf32> to vector<16x8xf32>
    %22 = arith.addf %18, %21 : vector<16x8xf32>
    %cst_17 = arith.constant 0.000000e+00 : f32
    %23 = vector.broadcast %cst_17 : f32 to vector<16x8xf32>
    %24 = arith.cmpf ogt, %22, %23 : vector<16x8xf32>
    %cst_18 = arith.constant 2.000000e-01 : f32
    %25 = vector.broadcast %cst_18 : f32 to vector<16x8xf32>
    %26 = arith.mulf %25, %22 : vector<16x8xf32>
    %27 = arith.select %24, %22, %26 : vector<16x8xi1>, vector<16x8xf32>
    %28 = tpu.transpose %17, [1, 0] : vector<16x8xf32> -> vector<8x16xf32>
    %29 = arith.truncf %14 : vector<16x128xf32> to vector<16x128xbf16>
    %cst_19 = arith.constant 1.000000e+00 : bf16
    %30 = vector.broadcast %cst_19 : bf16 to vector<16x1xbf16>
    %c0_20 = arith.constant 0 : index
    %c0_21 = arith.constant 0 : index
    %31 = vector.load %arg7[%c0_20, %c0_21] : memref<2x16xf32, #tpu.memory_space<vmem>>, vector<2x16xf32>
    %c0_22 = arith.constant 0 : index
    %c0_23 = arith.constant 0 : index
    %32 = vector.load %arg6[%c0_22, %c0_23] : memref<1x128xf32, #tpu.memory_space<vmem>>, vector<1x128xf32>
    %c0_24 = arith.constant 0 : index
    %c0_25 = arith.constant 0 : index
    %33 = vector.load %arg9[%c0_24, %c0_25] : memref<128x16xf32, #tpu.memory_space<vmem>>, vector<128x16xf32>
    %cst_26 = arith.constant dense<0.000000e+00> : vector<2x16xf32>
    %34 = tpu.matmul %31, %12, %cst_26 {dimension_numbers = #tpu.dot_dimension_numbers<[1], [0], [0], [1], [0, 0, 1, 1], [], []>} : vector<2x16xf32>, vector<16x16xf32>, vector<2x16xf32> -> vector<2x16xf32>
    %c0_27 = arith.constant 0 : index
    %c0_28 = arith.constant 0 : index
    %35 = vector.load %arg8[%c0_27, %c0_28] : memref<16x16xf32, #tpu.memory_space<vmem>>, vector<16x16xf32>
    %cst_29 = arith.constant dense<0.000000e+00> : vector<2x16xf32>
    %36 = tpu.matmul %34, %35, %cst_29 {dimension_numbers = #tpu.dot_dimension_numbers<[1], [0], [0], [1], [0, 0, 1, 1], [], []>} : vector<2x16xf32>, vector<16x16xf32>, vector<2x16xf32> -> vector<2x16xf32>
    %c0_30 = arith.constant 0 : index
    %c0_31 = arith.constant 0 : index
    %37 = vector.load %arg10[%c0_30, %c0_31] : memref<1x16xf32, #tpu.memory_space<vmem>>, vector<1x16xf32>
    %38 = vector.broadcast %37 : vector<1x16xf32> to vector<2x16xf32>
    %39 = arith.addf %36, %38 : vector<2x16xf32>
    %40 = vector.extract_strided_slice %18 {offsets = [0, 0], sizes = [16, 1], strides = [1, 1]} : vector<16x8xf32> to vector<16x1xf32>
    %41 = vector.extract_strided_slice %28 {offsets = [0, 0], sizes = [1, 16], strides = [1, 1]} : vector<8x16xf32> to vector<1x16xf32>
    %42 = vector.broadcast %40 : vector<16x1xf32> to vector<16x16xf32>
    %43 = vector.broadcast %41 : vector<1x16xf32> to vector<16x16xf32>
    %44 = arith.addf %42, %43 : vector<16x16xf32>
    %cst_32 = arith.constant 0.000000e+00 : f32
    %45 = vector.broadcast %cst_32 : f32 to vector<16x16xf32>
    %46 = arith.cmpf ogt, %44, %45 : vector<16x16xf32>
    %cst_33 = arith.constant 2.000000e-01 : f32
    %47 = vector.broadcast %cst_33 : f32 to vector<16x16xf32>
    %48 = arith.mulf %47, %44 : vector<16x16xf32>
    %49 = arith.select %46, %44, %48 : vector<16x16xi1>, vector<16x16xf32>
    %50 = vector.extract_strided_slice %27 {offsets = [0, 0], sizes = [16, 1], strides = [1, 1]} : vector<16x8xf32> to vector<16x1xf32>
    %51 = vector.broadcast %50 : vector<16x1xf32> to vector<16x16xf32>
    %52 = arith.subf %49, %51 : vector<16x16xf32>
    %cst_34 = arith.constant -1.000000e+30 : f32
    %53 = vector.broadcast %cst_34 : f32 to vector<16x16xf32>
    %54 = arith.select %2, %52, %53 : vector<16x16xi1>, vector<16x16xf32>
    %55 = math.exp %54 : vector<16x16xf32>
    %56 = arith.truncf %55 : vector<16x16xf32> to vector<16x16xbf16>
    %57 = vector.extract_strided_slice %29 {offsets = [0, 0], sizes = [16, 16], strides = [1, 1]} : vector<16x128xbf16> to vector<16x16xbf16>
    %cst_35 = arith.constant dense<0.000000e+00> : vector<16x16xf32>
    %58 = tpu.matmul %56, %57, %cst_35 {dimension_numbers = #tpu.dot_dimension_numbers<[1], [0], [0], [1], [0, 0, 1, 1], [], []>} : vector<16x16xbf16>, vector<16x16xbf16>, vector<16x16xf32> -> vector<16x16xf32>
    %cst_36 = arith.constant dense<0.000000e+00> : vector<16x1xf32>
    %59 = tpu.matmul %56, %30, %cst_36 {dimension_numbers = #tpu.dot_dimension_numbers<[1], [0], [0], [1], [0, 0, 1, 1], [], []>} : vector<16x16xbf16>, vector<16x1xbf16>, vector<16x1xf32> -> vector<16x1xf32>
    %cst_37 = arith.constant 1.000000e-30 : f32
    %60 = vector.broadcast %cst_37 : f32 to vector<16x1xf32>
    %61 = arith.maximumf %59, %60 : vector<16x1xf32>
    %62 = tpu.reciprocal %61 {approx = true} : vector<16x1xf32> -> vector<16x1xf32>
    %63 = vector.broadcast %62 : vector<16x1xf32> to vector<16x16xf32>
    %64 = arith.mulf %58, %63 : vector<16x16xf32>
    %65 = vector.extract_strided_slice %32 {offsets = [0, 0], sizes = [1, 16], strides = [1, 1]} : vector<1x128xf32> to vector<1x16xf32>
    %66 = vector.broadcast %65 : vector<1x16xf32> to vector<16x16xf32>
    %67 = arith.addf %64, %66 : vector<16x16xf32>
    %cst_38 = arith.constant 0.000000e+00 : f32
    %68 = vector.broadcast %cst_38 : f32 to vector<16x16xf32>
    %69 = arith.maximumf %67, %68 : vector<16x16xf32>
    %cst_39 = arith.constant dense<0.000000e+00> : vector<2x16xf32>
    %70 = tpu.matmul %31, %69, %cst_39 {dimension_numbers = #tpu.dot_dimension_numbers<[1], [0], [0], [1], [0, 0, 1, 1], [], []>} : vector<2x16xf32>, vector<16x16xf32>, vector<2x16xf32> -> vector<2x16xf32>
    %71 = vector.extract_strided_slice %33 {offsets = [0, 0], sizes = [16, 16], strides = [1, 1]} : vector<128x16xf32> to vector<16x16xf32>
    %cst_40 = arith.constant dense<0.000000e+00> : vector<2x16xf32>
    %72 = tpu.matmul %70, %71, %cst_40 {dimension_numbers = #tpu.dot_dimension_numbers<[1], [0], [0], [1], [0, 0, 1, 1], [], []>} : vector<2x16xf32>, vector<16x16xf32>, vector<2x16xf32> -> vector<2x16xf32>
    %73 = arith.addf %39, %72 : vector<2x16xf32>
    %74 = vector.extract_strided_slice %18 {offsets = [0, 1], sizes = [16, 1], strides = [1, 1]} : vector<16x8xf32> to vector<16x1xf32>
    %75 = vector.extract_strided_slice %28 {offsets = [1, 0], sizes = [1, 16], strides = [1, 1]} : vector<8x16xf32> to vector<1x16xf32>
    %76 = vector.broadcast %74 : vector<16x1xf32> to vector<16x16xf32>
    %77 = vector.broadcast %75 : vector<1x16xf32> to vector<16x16xf32>
    %78 = arith.addf %76, %77 : vector<16x16xf32>
    %cst_41 = arith.constant 0.000000e+00 : f32
    %79 = vector.broadcast %cst_41 : f32 to vector<16x16xf32>
    %80 = arith.cmpf ogt, %78, %79 : vector<16x16xf32>
    %cst_42 = arith.constant 2.000000e-01 : f32
    %81 = vector.broadcast %cst_42 : f32 to vector<16x16xf32>
    %82 = arith.mulf %81, %78 : vector<16x16xf32>
    %83 = arith.select %80, %78, %82 : vector<16x16xi1>, vector<16x16xf32>
    %84 = vector.extract_strided_slice %27 {offsets = [0, 1], sizes = [16, 1], strides = [1, 1]} : vector<16x8xf32> to vector<16x1xf32>
    %85 = vector.broadcast %84 : vector<16x1xf32> to vector<16x16xf32>
    %86 = arith.subf %83, %85 : vector<16x16xf32>
    %cst_43 = arith.constant -1.000000e+30 : f32
    %87 = vector.broadcast %cst_43 : f32 to vector<16x16xf32>
    %88 = arith.select %2, %86, %87 : vector<16x16xi1>, vector<16x16xf32>
    %89 = math.exp %88 : vector<16x16xf32>
    %90 = arith.truncf %89 : vector<16x16xf32> to vector<16x16xbf16>
    %91 = vector.extract_strided_slice %29 {offsets = [0, 16], sizes = [16, 16], strides = [1, 1]} : vector<16x128xbf16> to vector<16x16xbf16>
    %cst_44 = arith.constant dense<0.000000e+00> : vector<16x16xf32>
    %92 = tpu.matmul %90, %91, %cst_44 {dimension_numbers = #tpu.dot_dimension_numbers<[1], [0], [0], [1], [0, 0, 1, 1], [], []>} : vector<16x16xbf16>, vector<16x16xbf16>, vector<16x16xf32> -> vector<16x16xf32>
    %cst_45 = arith.constant dense<0.000000e+00> : vector<16x1xf32>
    %93 = tpu.matmul %90, %30, %cst_45 {dimension_numbers = #tpu.dot_dimension_numbers<[1], [0], [0], [1], [0, 0, 1, 1], [], []>} : vector<16x16xbf16>, vector<16x1xbf16>, vector<16x1xf32> -> vector<16x1xf32>
    %cst_46 = arith.constant 1.000000e-30 : f32
    %94 = vector.broadcast %cst_46 : f32 to vector<16x1xf32>
    %95 = arith.maximumf %93, %94 : vector<16x1xf32>
    %96 = tpu.reciprocal %95 {approx = true} : vector<16x1xf32> -> vector<16x1xf32>
    %97 = vector.broadcast %96 : vector<16x1xf32> to vector<16x16xf32>
    %98 = arith.mulf %92, %97 : vector<16x16xf32>
    %99 = vector.extract_strided_slice %32 {offsets = [0, 16], sizes = [1, 16], strides = [1, 1]} : vector<1x128xf32> to vector<1x16xf32>
    %100 = vector.broadcast %99 : vector<1x16xf32> to vector<16x16xf32>
    %101 = arith.addf %98, %100 : vector<16x16xf32>
    %cst_47 = arith.constant 0.000000e+00 : f32
    %102 = vector.broadcast %cst_47 : f32 to vector<16x16xf32>
    %103 = arith.maximumf %101, %102 : vector<16x16xf32>
    %cst_48 = arith.constant dense<0.000000e+00> : vector<2x16xf32>
    %104 = tpu.matmul %31, %103, %cst_48 {dimension_numbers = #tpu.dot_dimension_numbers<[1], [0], [0], [1], [0, 0, 1, 1], [], []>} : vector<2x16xf32>, vector<16x16xf32>, vector<2x16xf32> -> vector<2x16xf32>
    %105 = vector.extract_strided_slice %33 {offsets = [16, 0], sizes = [16, 16], strides = [1, 1]} : vector<128x16xf32> to vector<16x16xf32>
    %cst_49 = arith.constant dense<0.000000e+00> : vector<2x16xf32>
    %106 = tpu.matmul %104, %105, %cst_49 {dimension_numbers = #tpu.dot_dimension_numbers<[1], [0], [0], [1], [0, 0, 1, 1], [], []>} : vector<2x16xf32>, vector<16x16xf32>, vector<2x16xf32> -> vector<2x16xf32>
    %107 = arith.addf %73, %106 : vector<2x16xf32>
    %108 = vector.extract_strided_slice %18 {offsets = [0, 2], sizes = [16, 1], strides = [1, 1]} : vector<16x8xf32> to vector<16x1xf32>
    %109 = vector.extract_strided_slice %28 {offsets = [2, 0], sizes = [1, 16], strides = [1, 1]} : vector<8x16xf32> to vector<1x16xf32>
    %110 = vector.broadcast %108 : vector<16x1xf32> to vector<16x16xf32>
    %111 = vector.broadcast %109 : vector<1x16xf32> to vector<16x16xf32>
    %112 = arith.addf %110, %111 : vector<16x16xf32>
    %cst_50 = arith.constant 0.000000e+00 : f32
    %113 = vector.broadcast %cst_50 : f32 to vector<16x16xf32>
    %114 = arith.cmpf ogt, %112, %113 : vector<16x16xf32>
    %cst_51 = arith.constant 2.000000e-01 : f32
    %115 = vector.broadcast %cst_51 : f32 to vector<16x16xf32>
    %116 = arith.mulf %115, %112 : vector<16x16xf32>
    %117 = arith.select %114, %112, %116 : vector<16x16xi1>, vector<16x16xf32>
    %118 = vector.extract_strided_slice %27 {offsets = [0, 2], sizes = [16, 1], strides = [1, 1]} : vector<16x8xf32> to vector<16x1xf32>
    %119 = vector.broadcast %118 : vector<16x1xf32> to vector<16x16xf32>
    %120 = arith.subf %117, %119 : vector<16x16xf32>
    %cst_52 = arith.constant -1.000000e+30 : f32
    %121 = vector.broadcast %cst_52 : f32 to vector<16x16xf32>
    %122 = arith.select %2, %120, %121 : vector<16x16xi1>, vector<16x16xf32>
    %123 = math.exp %122 : vector<16x16xf32>
    %124 = arith.truncf %123 : vector<16x16xf32> to vector<16x16xbf16>
    %125 = vector.extract_strided_slice %29 {offsets = [0, 32], sizes = [16, 16], strides = [1, 1]} : vector<16x128xbf16> to vector<16x16xbf16>
    %cst_53 = arith.constant dense<0.000000e+00> : vector<16x16xf32>
    %126 = tpu.matmul %124, %125, %cst_53 {dimension_numbers = #tpu.dot_dimension_numbers<[1], [0], [0], [1], [0, 0, 1, 1], [], []>} : vector<16x16xbf16>, vector<16x16xbf16>, vector<16x16xf32> -> vector<16x16xf32>
    %cst_54 = arith.constant dense<0.000000e+00> : vector<16x1xf32>
    %127 = tpu.matmul %124, %30, %cst_54 {dimension_numbers = #tpu.dot_dimension_numbers<[1], [0], [0], [1], [0, 0, 1, 1], [], []>} : vector<16x16xbf16>, vector<16x1xbf16>, vector<16x1xf32> -> vector<16x1xf32>
    %cst_55 = arith.constant 1.000000e-30 : f32
    %128 = vector.broadcast %cst_55 : f32 to vector<16x1xf32>
    %129 = arith.maximumf %127, %128 : vector<16x1xf32>
    %130 = tpu.reciprocal %129 {approx = true} : vector<16x1xf32> -> vector<16x1xf32>
    %131 = vector.broadcast %130 : vector<16x1xf32> to vector<16x16xf32>
    %132 = arith.mulf %126, %131 : vector<16x16xf32>
    %133 = vector.extract_strided_slice %32 {offsets = [0, 32], sizes = [1, 16], strides = [1, 1]} : vector<1x128xf32> to vector<1x16xf32>
    %134 = vector.broadcast %133 : vector<1x16xf32> to vector<16x16xf32>
    %135 = arith.addf %132, %134 : vector<16x16xf32>
    %cst_56 = arith.constant 0.000000e+00 : f32
    %136 = vector.broadcast %cst_56 : f32 to vector<16x16xf32>
    %137 = arith.maximumf %135, %136 : vector<16x16xf32>
    %cst_57 = arith.constant dense<0.000000e+00> : vector<2x16xf32>
    %138 = tpu.matmul %31, %137, %cst_57 {dimension_numbers = #tpu.dot_dimension_numbers<[1], [0], [0], [1], [0, 0, 1, 1], [], []>} : vector<2x16xf32>, vector<16x16xf32>, vector<2x16xf32> -> vector<2x16xf32>
    %139 = vector.extract_strided_slice %33 {offsets = [32, 0], sizes = [16, 16], strides = [1, 1]} : vector<128x16xf32> to vector<16x16xf32>
    %cst_58 = arith.constant dense<0.000000e+00> : vector<2x16xf32>
    %140 = tpu.matmul %138, %139, %cst_58 {dimension_numbers = #tpu.dot_dimension_numbers<[1], [0], [0], [1], [0, 0, 1, 1], [], []>} : vector<2x16xf32>, vector<16x16xf32>, vector<2x16xf32> -> vector<2x16xf32>
    %141 = arith.addf %107, %140 : vector<2x16xf32>
    %142 = vector.extract_strided_slice %18 {offsets = [0, 3], sizes = [16, 1], strides = [1, 1]} : vector<16x8xf32> to vector<16x1xf32>
    %143 = vector.extract_strided_slice %28 {offsets = [3, 0], sizes = [1, 16], strides = [1, 1]} : vector<8x16xf32> to vector<1x16xf32>
    %144 = vector.broadcast %142 : vector<16x1xf32> to vector<16x16xf32>
    %145 = vector.broadcast %143 : vector<1x16xf32> to vector<16x16xf32>
    %146 = arith.addf %144, %145 : vector<16x16xf32>
    %cst_59 = arith.constant 0.000000e+00 : f32
    %147 = vector.broadcast %cst_59 : f32 to vector<16x16xf32>
    %148 = arith.cmpf ogt, %146, %147 : vector<16x16xf32>
    %cst_60 = arith.constant 2.000000e-01 : f32
    %149 = vector.broadcast %cst_60 : f32 to vector<16x16xf32>
    %150 = arith.mulf %149, %146 : vector<16x16xf32>
    %151 = arith.select %148, %146, %150 : vector<16x16xi1>, vector<16x16xf32>
    %152 = vector.extract_strided_slice %27 {offsets = [0, 3], sizes = [16, 1], strides = [1, 1]} : vector<16x8xf32> to vector<16x1xf32>
    %153 = vector.broadcast %152 : vector<16x1xf32> to vector<16x16xf32>
    %154 = arith.subf %151, %153 : vector<16x16xf32>
    %cst_61 = arith.constant -1.000000e+30 : f32
    %155 = vector.broadcast %cst_61 : f32 to vector<16x16xf32>
    %156 = arith.select %2, %154, %155 : vector<16x16xi1>, vector<16x16xf32>
    %157 = math.exp %156 : vector<16x16xf32>
    %158 = arith.truncf %157 : vector<16x16xf32> to vector<16x16xbf16>
    %159 = vector.extract_strided_slice %29 {offsets = [0, 48], sizes = [16, 16], strides = [1, 1]} : vector<16x128xbf16> to vector<16x16xbf16>
    %cst_62 = arith.constant dense<0.000000e+00> : vector<16x16xf32>
    %160 = tpu.matmul %158, %159, %cst_62 {dimension_numbers = #tpu.dot_dimension_numbers<[1], [0], [0], [1], [0, 0, 1, 1], [], []>} : vector<16x16xbf16>, vector<16x16xbf16>, vector<16x16xf32> -> vector<16x16xf32>
    %cst_63 = arith.constant dense<0.000000e+00> : vector<16x1xf32>
    %161 = tpu.matmul %158, %30, %cst_63 {dimension_numbers = #tpu.dot_dimension_numbers<[1], [0], [0], [1], [0, 0, 1, 1], [], []>} : vector<16x16xbf16>, vector<16x1xbf16>, vector<16x1xf32> -> vector<16x1xf32>
    %cst_64 = arith.constant 1.000000e-30 : f32
    %162 = vector.broadcast %cst_64 : f32 to vector<16x1xf32>
    %163 = arith.maximumf %161, %162 : vector<16x1xf32>
    %164 = tpu.reciprocal %163 {approx = true} : vector<16x1xf32> -> vector<16x1xf32>
    %165 = vector.broadcast %164 : vector<16x1xf32> to vector<16x16xf32>
    %166 = arith.mulf %160, %165 : vector<16x16xf32>
    %167 = vector.extract_strided_slice %32 {offsets = [0, 48], sizes = [1, 16], strides = [1, 1]} : vector<1x128xf32> to vector<1x16xf32>
    %168 = vector.broadcast %167 : vector<1x16xf32> to vector<16x16xf32>
    %169 = arith.addf %166, %168 : vector<16x16xf32>
    %cst_65 = arith.constant 0.000000e+00 : f32
    %170 = vector.broadcast %cst_65 : f32 to vector<16x16xf32>
    %171 = arith.maximumf %169, %170 : vector<16x16xf32>
    %cst_66 = arith.constant dense<0.000000e+00> : vector<2x16xf32>
    %172 = tpu.matmul %31, %171, %cst_66 {dimension_numbers = #tpu.dot_dimension_numbers<[1], [0], [0], [1], [0, 0, 1, 1], [], []>} : vector<2x16xf32>, vector<16x16xf32>, vector<2x16xf32> -> vector<2x16xf32>
    %173 = vector.extract_strided_slice %33 {offsets = [48, 0], sizes = [16, 16], strides = [1, 1]} : vector<128x16xf32> to vector<16x16xf32>
    %cst_67 = arith.constant dense<0.000000e+00> : vector<2x16xf32>
    %174 = tpu.matmul %172, %173, %cst_67 {dimension_numbers = #tpu.dot_dimension_numbers<[1], [0], [0], [1], [0, 0, 1, 1], [], []>} : vector<2x16xf32>, vector<16x16xf32>, vector<2x16xf32> -> vector<2x16xf32>
    %175 = arith.addf %141, %174 : vector<2x16xf32>
    %176 = vector.extract_strided_slice %18 {offsets = [0, 4], sizes = [16, 1], strides = [1, 1]} : vector<16x8xf32> to vector<16x1xf32>
    %177 = vector.extract_strided_slice %28 {offsets = [4, 0], sizes = [1, 16], strides = [1, 1]} : vector<8x16xf32> to vector<1x16xf32>
    %178 = vector.broadcast %176 : vector<16x1xf32> to vector<16x16xf32>
    %179 = vector.broadcast %177 : vector<1x16xf32> to vector<16x16xf32>
    %180 = arith.addf %178, %179 : vector<16x16xf32>
    %cst_68 = arith.constant 0.000000e+00 : f32
    %181 = vector.broadcast %cst_68 : f32 to vector<16x16xf32>
    %182 = arith.cmpf ogt, %180, %181 : vector<16x16xf32>
    %cst_69 = arith.constant 2.000000e-01 : f32
    %183 = vector.broadcast %cst_69 : f32 to vector<16x16xf32>
    %184 = arith.mulf %183, %180 : vector<16x16xf32>
    %185 = arith.select %182, %180, %184 : vector<16x16xi1>, vector<16x16xf32>
    %186 = vector.extract_strided_slice %27 {offsets = [0, 4], sizes = [16, 1], strides = [1, 1]} : vector<16x8xf32> to vector<16x1xf32>
    %187 = vector.broadcast %186 : vector<16x1xf32> to vector<16x16xf32>
    %188 = arith.subf %185, %187 : vector<16x16xf32>
    %cst_70 = arith.constant -1.000000e+30 : f32
    %189 = vector.broadcast %cst_70 : f32 to vector<16x16xf32>
    %190 = arith.select %2, %188, %189 : vector<16x16xi1>, vector<16x16xf32>
    %191 = math.exp %190 : vector<16x16xf32>
    %192 = arith.truncf %191 : vector<16x16xf32> to vector<16x16xbf16>
    %193 = vector.extract_strided_slice %29 {offsets = [0, 64], sizes = [16, 16], strides = [1, 1]} : vector<16x128xbf16> to vector<16x16xbf16>
    %cst_71 = arith.constant dense<0.000000e+00> : vector<16x16xf32>
    %194 = tpu.matmul %192, %193, %cst_71 {dimension_numbers = #tpu.dot_dimension_numbers<[1], [0], [0], [1], [0, 0, 1, 1], [], []>} : vector<16x16xbf16>, vector<16x16xbf16>, vector<16x16xf32> -> vector<16x16xf32>
    %cst_72 = arith.constant dense<0.000000e+00> : vector<16x1xf32>
    %195 = tpu.matmul %192, %30, %cst_72 {dimension_numbers = #tpu.dot_dimension_numbers<[1], [0], [0], [1], [0, 0, 1, 1], [], []>} : vector<16x16xbf16>, vector<16x1xbf16>, vector<16x1xf32> -> vector<16x1xf32>
    %cst_73 = arith.constant 1.000000e-30 : f32
    %196 = vector.broadcast %cst_73 : f32 to vector<16x1xf32>
    %197 = arith.maximumf %195, %196 : vector<16x1xf32>
    %198 = tpu.reciprocal %197 {approx = true} : vector<16x1xf32> -> vector<16x1xf32>
    %199 = vector.broadcast %198 : vector<16x1xf32> to vector<16x16xf32>
    %200 = arith.mulf %194, %199 : vector<16x16xf32>
    %201 = vector.extract_strided_slice %32 {offsets = [0, 64], sizes = [1, 16], strides = [1, 1]} : vector<1x128xf32> to vector<1x16xf32>
    %202 = vector.broadcast %201 : vector<1x16xf32> to vector<16x16xf32>
    %203 = arith.addf %200, %202 : vector<16x16xf32>
    %cst_74 = arith.constant 0.000000e+00 : f32
    %204 = vector.broadcast %cst_74 : f32 to vector<16x16xf32>
    %205 = arith.maximumf %203, %204 : vector<16x16xf32>
    %cst_75 = arith.constant dense<0.000000e+00> : vector<2x16xf32>
    %206 = tpu.matmul %31, %205, %cst_75 {dimension_numbers = #tpu.dot_dimension_numbers<[1], [0], [0], [1], [0, 0, 1, 1], [], []>} : vector<2x16xf32>, vector<16x16xf32>, vector<2x16xf32> -> vector<2x16xf32>
    %207 = vector.extract_strided_slice %33 {offsets = [64, 0], sizes = [16, 16], strides = [1, 1]} : vector<128x16xf32> to vector<16x16xf32>
    %cst_76 = arith.constant dense<0.000000e+00> : vector<2x16xf32>
    %208 = tpu.matmul %206, %207, %cst_76 {dimension_numbers = #tpu.dot_dimension_numbers<[1], [0], [0], [1], [0, 0, 1, 1], [], []>} : vector<2x16xf32>, vector<16x16xf32>, vector<2x16xf32> -> vector<2x16xf32>
    %209 = arith.addf %175, %208 : vector<2x16xf32>
    %210 = vector.extract_strided_slice %18 {offsets = [0, 5], sizes = [16, 1], strides = [1, 1]} : vector<16x8xf32> to vector<16x1xf32>
    %211 = vector.extract_strided_slice %28 {offsets = [5, 0], sizes = [1, 16], strides = [1, 1]} : vector<8x16xf32> to vector<1x16xf32>
    %212 = vector.broadcast %210 : vector<16x1xf32> to vector<16x16xf32>
    %213 = vector.broadcast %211 : vector<1x16xf32> to vector<16x16xf32>
    %214 = arith.addf %212, %213 : vector<16x16xf32>
    %cst_77 = arith.constant 0.000000e+00 : f32
    %215 = vector.broadcast %cst_77 : f32 to vector<16x16xf32>
    %216 = arith.cmpf ogt, %214, %215 : vector<16x16xf32>
    %cst_78 = arith.constant 2.000000e-01 : f32
    %217 = vector.broadcast %cst_78 : f32 to vector<16x16xf32>
    %218 = arith.mulf %217, %214 : vector<16x16xf32>
    %219 = arith.select %216, %214, %218 : vector<16x16xi1>, vector<16x16xf32>
    %220 = vector.extract_strided_slice %27 {offsets = [0, 5], sizes = [16, 1], strides = [1, 1]} : vector<16x8xf32> to vector<16x1xf32>
    %221 = vector.broadcast %220 : vector<16x1xf32> to vector<16x16xf32>
    %222 = arith.subf %219, %221 : vector<16x16xf32>
    %cst_79 = arith.constant -1.000000e+30 : f32
    %223 = vector.broadcast %cst_79 : f32 to vector<16x16xf32>
    %224 = arith.select %2, %222, %223 : vector<16x16xi1>, vector<16x16xf32>
    %225 = math.exp %224 : vector<16x16xf32>
    %226 = arith.truncf %225 : vector<16x16xf32> to vector<16x16xbf16>
    %227 = vector.extract_strided_slice %29 {offsets = [0, 80], sizes = [16, 16], strides = [1, 1]} : vector<16x128xbf16> to vector<16x16xbf16>
    %cst_80 = arith.constant dense<0.000000e+00> : vector<16x16xf32>
    %228 = tpu.matmul %226, %227, %cst_80 {dimension_numbers = #tpu.dot_dimension_numbers<[1], [0], [0], [1], [0, 0, 1, 1], [], []>} : vector<16x16xbf16>, vector<16x16xbf16>, vector<16x16xf32> -> vector<16x16xf32>
    %cst_81 = arith.constant dense<0.000000e+00> : vector<16x1xf32>
    %229 = tpu.matmul %226, %30, %cst_81 {dimension_numbers = #tpu.dot_dimension_numbers<[1], [0], [0], [1], [0, 0, 1, 1], [], []>} : vector<16x16xbf16>, vector<16x1xbf16>, vector<16x1xf32> -> vector<16x1xf32>
    %cst_82 = arith.constant 1.000000e-30 : f32
    %230 = vector.broadcast %cst_82 : f32 to vector<16x1xf32>
    %231 = arith.maximumf %229, %230 : vector<16x1xf32>
    %232 = tpu.reciprocal %231 {approx = true} : vector<16x1xf32> -> vector<16x1xf32>
    %233 = vector.broadcast %232 : vector<16x1xf32> to vector<16x16xf32>
    %234 = arith.mulf %228, %233 : vector<16x16xf32>
    %235 = vector.extract_strided_slice %32 {offsets = [0, 80], sizes = [1, 16], strides = [1, 1]} : vector<1x128xf32> to vector<1x16xf32>
    %236 = vector.broadcast %235 : vector<1x16xf32> to vector<16x16xf32>
    %237 = arith.addf %234, %236 : vector<16x16xf32>
    %cst_83 = arith.constant 0.000000e+00 : f32
    %238 = vector.broadcast %cst_83 : f32 to vector<16x16xf32>
    %239 = arith.maximumf %237, %238 : vector<16x16xf32>
    %cst_84 = arith.constant dense<0.000000e+00> : vector<2x16xf32>
    %240 = tpu.matmul %31, %239, %cst_84 {dimension_numbers = #tpu.dot_dimension_numbers<[1], [0], [0], [1], [0, 0, 1, 1], [], []>} : vector<2x16xf32>, vector<16x16xf32>, vector<2x16xf32> -> vector<2x16xf32>
    %241 = vector.extract_strided_slice %33 {offsets = [80, 0], sizes = [16, 16], strides = [1, 1]} : vector<128x16xf32> to vector<16x16xf32>
    %cst_85 = arith.constant dense<0.000000e+00> : vector<2x16xf32>
    %242 = tpu.matmul %240, %241, %cst_85 {dimension_numbers = #tpu.dot_dimension_numbers<[1], [0], [0], [1], [0, 0, 1, 1], [], []>} : vector<2x16xf32>, vector<16x16xf32>, vector<2x16xf32> -> vector<2x16xf32>
    %243 = arith.addf %209, %242 : vector<2x16xf32>
    %244 = vector.extract_strided_slice %18 {offsets = [0, 6], sizes = [16, 1], strides = [1, 1]} : vector<16x8xf32> to vector<16x1xf32>
    %245 = vector.extract_strided_slice %28 {offsets = [6, 0], sizes = [1, 16], strides = [1, 1]} : vector<8x16xf32> to vector<1x16xf32>
    %246 = vector.broadcast %244 : vector<16x1xf32> to vector<16x16xf32>
    %247 = vector.broadcast %245 : vector<1x16xf32> to vector<16x16xf32>
    %248 = arith.addf %246, %247 : vector<16x16xf32>
    %cst_86 = arith.constant 0.000000e+00 : f32
    %249 = vector.broadcast %cst_86 : f32 to vector<16x16xf32>
    %250 = arith.cmpf ogt, %248, %249 : vector<16x16xf32>
    %cst_87 = arith.constant 2.000000e-01 : f32
    %251 = vector.broadcast %cst_87 : f32 to vector<16x16xf32>
    %252 = arith.mulf %251, %248 : vector<16x16xf32>
    %253 = arith.select %250, %248, %252 : vector<16x16xi1>, vector<16x16xf32>
    %254 = vector.extract_strided_slice %27 {offsets = [0, 6], sizes = [16, 1], strides = [1, 1]} : vector<16x8xf32> to vector<16x1xf32>
    %255 = vector.broadcast %254 : vector<16x1xf32> to vector<16x16xf32>
    %256 = arith.subf %253, %255 : vector<16x16xf32>
    %cst_88 = arith.constant -1.000000e+30 : f32
    %257 = vector.broadcast %cst_88 : f32 to vector<16x16xf32>
    %258 = arith.select %2, %256, %257 : vector<16x16xi1>, vector<16x16xf32>
    %259 = math.exp %258 : vector<16x16xf32>
    %260 = arith.truncf %259 : vector<16x16xf32> to vector<16x16xbf16>
    %261 = vector.extract_strided_slice %29 {offsets = [0, 96], sizes = [16, 16], strides = [1, 1]} : vector<16x128xbf16> to vector<16x16xbf16>
    %cst_89 = arith.constant dense<0.000000e+00> : vector<16x16xf32>
    %262 = tpu.matmul %260, %261, %cst_89 {dimension_numbers = #tpu.dot_dimension_numbers<[1], [0], [0], [1], [0, 0, 1, 1], [], []>} : vector<16x16xbf16>, vector<16x16xbf16>, vector<16x16xf32> -> vector<16x16xf32>
    %cst_90 = arith.constant dense<0.000000e+00> : vector<16x1xf32>
    %263 = tpu.matmul %260, %30, %cst_90 {dimension_numbers = #tpu.dot_dimension_numbers<[1], [0], [0], [1], [0, 0, 1, 1], [], []>} : vector<16x16xbf16>, vector<16x1xbf16>, vector<16x1xf32> -> vector<16x1xf32>
    %cst_91 = arith.constant 1.000000e-30 : f32
    %264 = vector.broadcast %cst_91 : f32 to vector<16x1xf32>
    %265 = arith.maximumf %263, %264 : vector<16x1xf32>
    %266 = tpu.reciprocal %265 {approx = true} : vector<16x1xf32> -> vector<16x1xf32>
    %267 = vector.broadcast %266 : vector<16x1xf32> to vector<16x16xf32>
    %268 = arith.mulf %262, %267 : vector<16x16xf32>
    %269 = vector.extract_strided_slice %32 {offsets = [0, 96], sizes = [1, 16], strides = [1, 1]} : vector<1x128xf32> to vector<1x16xf32>
    %270 = vector.broadcast %269 : vector<1x16xf32> to vector<16x16xf32>
    %271 = arith.addf %268, %270 : vector<16x16xf32>
    %cst_92 = arith.constant 0.000000e+00 : f32
    %272 = vector.broadcast %cst_92 : f32 to vector<16x16xf32>
    %273 = arith.maximumf %271, %272 : vector<16x16xf32>
    %cst_93 = arith.constant dense<0.000000e+00> : vector<2x16xf32>
    %274 = tpu.matmul %31, %273, %cst_93 {dimension_numbers = #tpu.dot_dimension_numbers<[1], [0], [0], [1], [0, 0, 1, 1], [], []>} : vector<2x16xf32>, vector<16x16xf32>, vector<2x16xf32> -> vector<2x16xf32>
    %275 = vector.extract_strided_slice %33 {offsets = [96, 0], sizes = [16, 16], strides = [1, 1]} : vector<128x16xf32> to vector<16x16xf32>
    %cst_94 = arith.constant dense<0.000000e+00> : vector<2x16xf32>
    %276 = tpu.matmul %274, %275, %cst_94 {dimension_numbers = #tpu.dot_dimension_numbers<[1], [0], [0], [1], [0, 0, 1, 1], [], []>} : vector<2x16xf32>, vector<16x16xf32>, vector<2x16xf32> -> vector<2x16xf32>
    %277 = arith.addf %243, %276 : vector<2x16xf32>
    %278 = vector.extract_strided_slice %18 {offsets = [0, 7], sizes = [16, 1], strides = [1, 1]} : vector<16x8xf32> to vector<16x1xf32>
    %279 = vector.extract_strided_slice %28 {offsets = [7, 0], sizes = [1, 16], strides = [1, 1]} : vector<8x16xf32> to vector<1x16xf32>
    %280 = vector.broadcast %278 : vector<16x1xf32> to vector<16x16xf32>
    %281 = vector.broadcast %279 : vector<1x16xf32> to vector<16x16xf32>
    %282 = arith.addf %280, %281 : vector<16x16xf32>
    %cst_95 = arith.constant 0.000000e+00 : f32
    %283 = vector.broadcast %cst_95 : f32 to vector<16x16xf32>
    %284 = arith.cmpf ogt, %282, %283 : vector<16x16xf32>
    %cst_96 = arith.constant 2.000000e-01 : f32
    %285 = vector.broadcast %cst_96 : f32 to vector<16x16xf32>
    %286 = arith.mulf %285, %282 : vector<16x16xf32>
    %287 = arith.select %284, %282, %286 : vector<16x16xi1>, vector<16x16xf32>
    %288 = vector.extract_strided_slice %27 {offsets = [0, 7], sizes = [16, 1], strides = [1, 1]} : vector<16x8xf32> to vector<16x1xf32>
    %289 = vector.broadcast %288 : vector<16x1xf32> to vector<16x16xf32>
    %290 = arith.subf %287, %289 : vector<16x16xf32>
    %cst_97 = arith.constant -1.000000e+30 : f32
    %291 = vector.broadcast %cst_97 : f32 to vector<16x16xf32>
    %292 = arith.select %2, %290, %291 : vector<16x16xi1>, vector<16x16xf32>
    %293 = math.exp %292 : vector<16x16xf32>
    %294 = arith.truncf %293 : vector<16x16xf32> to vector<16x16xbf16>
    %295 = vector.extract_strided_slice %29 {offsets = [0, 112], sizes = [16, 16], strides = [1, 1]} : vector<16x128xbf16> to vector<16x16xbf16>
    %cst_98 = arith.constant dense<0.000000e+00> : vector<16x16xf32>
    %296 = tpu.matmul %294, %295, %cst_98 {dimension_numbers = #tpu.dot_dimension_numbers<[1], [0], [0], [1], [0, 0, 1, 1], [], []>} : vector<16x16xbf16>, vector<16x16xbf16>, vector<16x16xf32> -> vector<16x16xf32>
    %cst_99 = arith.constant dense<0.000000e+00> : vector<16x1xf32>
    %297 = tpu.matmul %294, %30, %cst_99 {dimension_numbers = #tpu.dot_dimension_numbers<[1], [0], [0], [1], [0, 0, 1, 1], [], []>} : vector<16x16xbf16>, vector<16x1xbf16>, vector<16x1xf32> -> vector<16x1xf32>
    %cst_100 = arith.constant 1.000000e-30 : f32
    %298 = vector.broadcast %cst_100 : f32 to vector<16x1xf32>
    %299 = arith.maximumf %297, %298 : vector<16x1xf32>
    %300 = tpu.reciprocal %299 {approx = true} : vector<16x1xf32> -> vector<16x1xf32>
    %301 = vector.broadcast %300 : vector<16x1xf32> to vector<16x16xf32>
    %302 = arith.mulf %296, %301 : vector<16x16xf32>
    %303 = vector.extract_strided_slice %32 {offsets = [0, 112], sizes = [1, 16], strides = [1, 1]} : vector<1x128xf32> to vector<1x16xf32>
    %304 = vector.broadcast %303 : vector<1x16xf32> to vector<16x16xf32>
    %305 = arith.addf %302, %304 : vector<16x16xf32>
    %cst_101 = arith.constant 0.000000e+00 : f32
    %306 = vector.broadcast %cst_101 : f32 to vector<16x16xf32>
    %307 = arith.maximumf %305, %306 : vector<16x16xf32>
    %cst_102 = arith.constant dense<0.000000e+00> : vector<2x16xf32>
    %308 = tpu.matmul %31, %307, %cst_102 {dimension_numbers = #tpu.dot_dimension_numbers<[1], [0], [0], [1], [0, 0, 1, 1], [], []>} : vector<2x16xf32>, vector<16x16xf32>, vector<2x16xf32> -> vector<2x16xf32>
    %309 = vector.extract_strided_slice %33 {offsets = [112, 0], sizes = [16, 16], strides = [1, 1]} : vector<128x16xf32> to vector<16x16xf32>
    %cst_103 = arith.constant dense<0.000000e+00> : vector<2x16xf32>
    %310 = tpu.matmul %308, %309, %cst_103 {dimension_numbers = #tpu.dot_dimension_numbers<[1], [0], [0], [1], [0, 0, 1, 1], [], []>} : vector<2x16xf32>, vector<16x16xf32>, vector<2x16xf32> -> vector<2x16xf32>
    %311 = arith.addf %277, %310 : vector<2x16xf32>
    %cst_104 = arith.constant 0.000000e+00 : f32
    %312 = vector.broadcast %cst_104 : f32 to vector<2x16xf32>
    %313 = arith.maximumf %311, %312 : vector<2x16xf32>
    %c0_105 = arith.constant 0 : index
    %c0_106 = arith.constant 0 : index
    %314 = vector.load %arg11[%c0_105, %c0_106] : memref<16x1xf32, #tpu.memory_space<vmem>>, vector<16x1xf32>
    %cst_107 = arith.constant dense<0.000000e+00> : vector<2x1xf32>
    %315 = tpu.matmul %313, %314, %cst_107 {dimension_numbers = #tpu.dot_dimension_numbers<[1], [0], [0], [1], [0, 0, 1, 1], [], []>} : vector<2x16xf32>, vector<16x1xf32>, vector<2x1xf32> -> vector<2x1xf32>
    %c0_108 = arith.constant 0 : index
    %c0_109 = arith.constant 0 : index
    %316 = vector.load %arg12[%c0_108, %c0_109] : memref<1x1xf32, #tpu.memory_space<vmem>>, vector<1x1xf32>
    %317 = vector.broadcast %316 : vector<1x1xf32> to vector<2x1xf32>
    %318 = arith.addf %315, %317 : vector<2x1xf32>
    %c0_110 = arith.constant 0 : index
    %c0_111 = arith.constant 0 : index
    %319 = vector.load %arg13[%c0_110, %c0_111] : memref<2x1xf32, #tpu.memory_space<vmem>>, vector<2x1xf32>
    tpu.vector_store %arg13[%c0_110, %c0_111], %318 {strides = array<i32>} : memref<2x1xf32, #tpu.memory_space<vmem>>, vector<2x1xf32>,
    return
  }
}

</mosaic_0001>

<bundles_post_ra>
// kernel: enhanced_gcn_forward.1
= control target key start
LH: loop header
LB: loop body
LE: loop exit
PB: predicated region body
PF: predicated region fallthrough
CT: control target
= control target key end

     0   :  { %vm64_vm0 = vcmask 1043456   ;;  %vm57_vm1 = vcmask 31744   ;;  %vm101_vm2 = vcmask 130048   ;;  %v1611_v39 = vmov 8   ;;  %s1614_s30 = smov 112   ;;  %s1621_s23 = smov 80   ;;  %s2076_s2 = inlined_call_operand.vmem [shape: f32[4,16], index: 2, kind: input, shape index: {}]   ;;  %s2077_s1 = inlined_call_operand.vmem [shape: f32[16,4], index: 1, kind: input, shape index: {}]   ;;  %s2078_s3 = inlined_call_operand.vmem [shape: f32[1,16], index: 3, kind: input, shape index: {}]   ;;  %s2079_s0 = inlined_call_operand.vmem [shape: bf16[16,16], index: 0, kind: input, shape index: {}]   ;;  %s2080_s4 = inlined_call_operand.vmem [shape: f32[16,128], index: 4, kind: input, shape index: {}]   ;;  %s2081_s5 = inlined_call_operand.vmem [shape: f32[128,16], index: 5, kind: input, shape index: {}]   ;;  %s2082_s7 = inlined_call_operand.vmem [shape: f32[2,16], index: 7, kind: input, shape index: {}]   ;;  %s2083_s8 = inlined_call_operand.vmem [shape: f32[16,16], index: 8, kind: input, shape index: {}]   ;;  %s2084_s6 = inlined_call_operand.vmem [shape: f32[1,128], index: 6, kind: input, shape index: {}]   ;;  %s2085_s10 = inlined_call_operand.vmem [shape: f32[1,16], index: 10, kind: input, shape index: {}]   ;;  %s2086_s9 = inlined_call_operand.vmem [shape: f32[128,16], index: 9, kind: input, shape index: {}]   ;;  %s2087_s11 = inlined_call_operand.vmem [shape: f32[16,1], index: 11, kind: input, shape index: {}]   ;;  %s2088_s12 = inlined_call_operand.<no memory space> [shape: f32[1,1], index: 12, kind: input, shape index: {}]   ;;  %s2089_s13 = inlined_call_operand.vmem [shape: f32[2,1], index: 13, kind: output, shape index: {}]  }
   0x1   :  { %v56_v0 = vld [vmem:[%s2076_s2] sm:$0xf]  ;;  %v55_v2 = vld [vmem:[%s2077_s1 + $0x8] sm:$0xff]  ;;  %v167_v9 = vld [vmem:[%s2081_s5 + $0x78] sm:$0xff]  ;;  %1506 = vset.pattern.permute.xlu1 %v1611_v39  ;;  %1505 = vset.pattern.permute.xlu0 %v1611_v39  ;;  %vm191_vm3 = vcmask 64512   ;;  %v1613_v51 = vmov 9  }
   0x2   :  { %v54_v1 = vld [vmem:[%s2077_s1] sm:$0xff]  ;;  %1440 = vmatpush.msk.msra.mxu0 %vm64_vm0, %v56_v0  ;;  %v122_v7 = vld [vmem:[%s2080_s4 + $0x8] sm:$0xff]  ;;  %v166_v10 = vld [vmem:[%s2081_s5 + $0x70] sm:$0xff]  ;;  %168 = vmatpush.msra.mxu3 %v167_v9  ;;  %v1615_v62 = vmov 10   ;;  %v1616_v63 = vmov 12   ;;  %s1624_s15 = smov 48  }
   0x3   :  { %1441 = vmatmul.msk.f32.vlgmr.msra.gmra.mxu0 %vm57_vm1, %v54_v1  ;;  %v1485_v6 = vld [vmem:[%s2079_s0] sm:$0xff]  ;;  %143 = vmatpush.msra.mxu2 %v122_v7  ;;  %v165_v11 = vld [vmem:[%s2081_s5 + $0x68] sm:$0xff]  ;;  %v163_v13 = vld [vmem:[%s2081_s5 + $0x58] sm:$0xff]  ;;  %v1617_v1 = vmov 1065369472   ;;  %s1626_s2 = smov 32  }
   0x4   :  { %v121_v8 = vld [vmem:[%s2080_s4] sm:$0xff]  ;;  %169 = vmatpush.msra.mxu3 %v166_v10  ;;  %v162_v14 = vld [vmem:[%s2081_s5 + $0x50] sm:$0xff]  ;;  %v161_v15 = vld [vmem:[%s2081_s5 + $0x48] sm:$0xff]  ;;  %1507 = vset.pattern.permute.xlu2 %v1611_v39 }
   0x5   :  { %144 = vmatpush.msra.mxu2 %v121_v8  ;;  %v164_v12 = vld [vmem:[%s2081_s5 + $0x60] sm:$0xff]  ;;  %v159_v18 = vld [vmem:[%s2081_s5 + $0x38] sm:$0xff]  ;;  %v158_v19 = vld [vmem:[%s2081_s5 + $0x30] sm:$0xff] }
   0x6   :  { %170 = vmatpush.msra.mxu3 %v165_v11  ;;  %v160_v16 = vld [vmem:[%s2081_s5 + $0x40] sm:$0xff]  ;;  %v157_v22 = vld [vmem:[%s2081_s5 + $0x28] sm:$0xff]  ;;  %v155_v25 = vld [vmem:[%s2081_s5 + $0x18] sm:$0xff] }
   0x7   :  { %v1542_v17 = vld [vmem:[%s2078_s3] ss:$0 sm:$0xff]  ;;  %v154_v26 = vld [vmem:[%s2081_s5 + $0x10] sm:$0xff]  ;;  %v153_v29 = vld [vmem:[%s2081_s5 + $0x8] sm:$0xff] }
   0x8   :  { %171 = vmatpush.msra.mxu3 %v164_v12  ;;  %v156_v24 = vld [vmem:[%s2081_s5 + $0x20] sm:$0xff] }
   0x9   :  { %v152_v31 = vld [vmem:[%s2081_s5] sm:$0xff]  ;;  %s1612_s5 = smov 8  }
   0xa   :  { %172 = vmatpush.msra.mxu3 %v163_v13  ;;  %v1805_v0 = vld [vmem:[%s2082_s7] sm:$0x3] }
   0xb   :  { %1442 = vmatmul.msk.f32.gmra.mxu0 %vm57_vm1, %v55_v2  ;;  %v48_v7 = vld [vmem:[%s2079_s0] sm:$0xff]  }
   0xc   :  { %173 = vmatpush.msra.mxu3 %v162_v14  ;;  %v50_v12 = vunpack.c.l.bf16 %v48_v7  ;;  %v51_v13 = vunpack.c.h.bf16 %v48_v7 }
   0xe   :  { %174 = vmatpush.msra.mxu3 %v161_v15  ;;  %vm1818_vm8 = vcmp.gt.f32.partialorder %v50_v12, 0.0  ;;  %vm1822_vm9 = vcmp.gt.f32.partialorder %v51_v13, 0.0 }
  0x10   :  { %175 = vmatpush.msra.mxu3 %v160_v16 }
  0x12   :  { %176 = vmatpush.msra.mxu3 %v159_v18 }
  0x14   :  { %177 = vmatpush.msra.mxu3 %v158_v19  ;;  %v261_v19 = vld [vmem:[%s2086_s9 + $0x60] sm:$0xff] }
  0x16   :  { %178 = vmatpush.msra.mxu3 %v157_v22 }
  0x18   :  { %179 = vmatpush.msra.mxu3 %v156_v24 }
  0x1a   :  { %180 = vmatpush.msra.mxu3 %v155_v25 }
  0x1c   :  { %181 = vmatpush.msra.mxu3 %v154_v26 }
  0x1e   :  { %182 = vmatpush.msra.mxu3 %v153_v29 }
  0x20   :  { %183 = vmatpush.msra.mxu3 %v152_v31 }
  0x80   :  { %v85_v3 = vpop.f32.mrf.mxu0 }
  0x88   :  { %v88_v4 = vpop.f32.mrf.mxu0 }
  0x89   :  { %v91_v5 = vpack.c.bf16 %v88_v4, %v85_v3 }
  0x8b   :  { %112 = vmatpush.bf16.msra.mxu1 %v91_v5 }
  0x8e   :  { %1447 = vmatmul.msk.bf16.vlgmr.msra.gmra.mxu1 %vm101_vm2, %v1485_v6 }
 0x10b   :  { %v114_v20 = vpop.f32.mrf.mxu1 }
 0x10c   :  { %v115_v21 = vadd.f32 %v1542_v17, %v114_v20 }
 0x10e   :  { %v119_v23 = vmax.f32 %v115_v21, 0.0 }
 0x110   :  { %1448 = vmatmul.msk.f32.vlgmr.msra.gmra.mxu2 %vm101_vm2, %v119_v23 }
 0x113   :  { %v116_v27 = vpop.f32.mrf.mxu1 }
 0x114   :  { %v117_v28 = vadd.f32 %v1542_v17, %v116_v27 }
 0x116   :  { %v120_v30 = vmax.f32 %v117_v28, 0.0 }
 0x118   :  { %1449 = vmatmul.msk.f32.gmra.mxu2 %vm101_vm2, %v120_v30  ;;  %282 = vmatpush.msrb.mxu0 %v120_v30 }
 0x11a   :  { %283 = vmatpush.msrb.mxu0 %v119_v23 }
 0x11b   :  { %1450 = vmatmul.msk.f32.vlgmr.msrb.gmra.mxu0 %vm101_vm2, %v1805_v0 }
 0x11c   :  { %385 = vmatpush.bf16.msra.mxu0 %v1617_v1 }
 0x120   :  { %520 = vmatpush.bf16.msrb.mxu0 %v1617_v1 }
 0x193   :  { %v146_v32 = vpop.f32.mrf.mxu2 }
 0x194   :  { %184 = vmatmul.f32.vlgmr.msra.gmra.mxu3 %v146_v32  ;;  %v245_v33 = vpack.c.bf16 %v146_v32, %v146_v32 }
 0x196   :  { %v357_v36 = vunpack.c.l.b16 %v245_v33 }
 0x19b   :  { %v149_v34 = vpop.f32.mrf.mxu2 }
 0x19c   :  { %v246_v35 = vpack.c.bf16 %v149_v34, %v149_v34  ;;  %187 = vmatmul.f32.gmra.mxu3 %v149_v34 }
 0x19e   :  { %v358_v37 = vunpack.c.l.b16 %v246_v35 }
 0x1a0   :  { %v1771_v38 = vpack.c.b16 %v358_v37, %v357_v36 }
 0x1a2   :  { %371 = vmatpush.bf16.msrb.mxu2 %v1771_v38 }
 0x217   :  { %v1774_v40 = vpop.f32.mrf.mxu3 }
 0x218   :  { %v192_v42 = vsel %vm191_vm3, %v1774_v40, -inf }
 0x21f   :  { %v1776_v41 = vpop.f32.mrf.mxu3 }
 0x220   :  { %324 = vperm.xlu1 %1506, %v1776_v41   ;;  %v193_v43 = vsel %vm191_vm3, %v1776_v41, -inf }
 0x221   :  { %v194_v44 = vmax.f32 %v192_v42, %v193_v43 }
 0x223   :  { %v195_v45 = vrot.slane %v194_v44, 4 }
 0x225   :  { %v196_v46 = vmax.f32 %v194_v44, %v195_v45 }
 0x227   :  { %v197_v47 = vrot.slane %v196_v46, 2 }
 0x229   :  { %v198_v48 = vmax.f32 %v196_v46, %v197_v47  ;;  %v289_v46 = vld [vmem:[%s2083_s8 + $0x8] sm:$0xff] }
 0x22a   :  { %311 = vmatpush.msrb.mxu1 %v289_v46 }
 0x22b   :  { %v199_v49 = vrot.slane %v198_v48, 1 }
 0x22d   :  { %v200_v50 = vmax.f32 %v198_v48, %v199_v49 }
 0x22f   :  { %202 = vrot.lane.b32.xlu0 %v200_v50, %s1612_s5  ;;  %v288_v50 = vld [vmem:[%s2083_s8] sm:$0xff] }
 0x230   :  { %312 = vmatpush.msrb.mxu1 %v288_v50 }
 0x237   :  { %319 = vperm.xlu0 %1505, %v1774_v40  }
 0x23f   :  { %1509 = vset.pattern.permute.xlu0 %v1613_v51 }
 0x240   :  { %464 = vperm.xlu0 %1509, %v1776_v41  }
 0x248   :  { %493 = vrot.lane.b32.xlu0 %v1771_v38, %s1614_s30 }
 0x292   :  { %v325_v2 = vpop.permute.xlu1 %324 }
 0x2a1   :  { %v203_v52 = vpop.permute.xlu0 %202 }
 0x2a2   :  { %v205_v53 = vadd.f32 %v203_v52, %v1774_v40  ;;  %v206_v54 = vadd.f32 %v203_v52, %v1776_v41  ;;  %v1618_v52 = vmov 0  }
 0x2a3   :  { %1511 = vset.pattern.permute.xlu0 %v1618_v52 }
 0x2a4   :  { %vm207_vm4 = vcmp.gt.f32.partialorder %v205_v53, 0.0  ;;  %vm208_vm5 = vcmp.gt.f32.partialorder %v206_v54, 0.0  ;;  %v209_v55 = vmul.f32 0.2, %v205_v53  ;;  %v210_v56 = vmul.f32 0.2, %v206_v54 }
 0x2a6   :  { %v1787_v57 = vsel %vm207_vm4, %v205_v53, %v209_v55  ;;  %v1789_v58 = vsel %vm208_vm5, %v206_v54, %v210_v56 }
 0x2a7   :  { %343 = vperm.xlu2 %1507, %v1789_v58   ;;  %338 = vperm.xlu1 %1506, %v1787_v57  }
 0x2a9   :  { %v320_v59 = vpop.permute.xlu0 %319 }
 0x2af   :  { %1508 = vset.pattern.permute.xlu1 %v1613_v51  ;;  %v285_v51 = vpop.f32.mrf.mxu0 }
 0x2b0   :  { %460 = vperm.xlu1 %1508, %v1774_v40   ;;  %1451 = vmatmul.msk.f32.vlgmr.msrb.gmra.mxu1 %vm101_vm2, %v285_v51 }
 0x2b2   :  { %v465_v60 = vpop.permute.xlu0 %464 }
 0x2b8   :  { %477 = vperm.xlu1 %1508, %v1787_v57  }
 0x2ba   :  { %v494_v61 = vpop.permute.xlu0 %493 }
 0x2bb   :  { %506 = vmatpush.bf16.msra.mxu2 %v494_v61 }
 0x2c0   :  { %481 = vperm.xlu1 %1508, %v1789_v58  }
 0x2c8   :  { %1510 = vset.pattern.permute.xlu1 %v1618_v52 }
 0x2cd   :  { %213 = vxpose.xlu2.b32.start [1/2] (short) (narrow) %v1774_v40, 8 }
 0x2d5   :  { %214 = vxpose.xlu2.b32.end [2/2] (short) (narrow) %v1776_v41, 8 }
 0x301   :  { %v344_v4 = vpop.permute.xlu2 %343 }
 0x319   :  { %v339_v3 = vpop.permute.xlu1 %338 }
 0x322   :  { %v461_v5 = vpop.permute.xlu1 %460 }
 0x32a   :  { %v478_v18 = vpop.permute.xlu1 %477 }
 0x332   :  { %v482_v33 = vpop.permute.xlu1 %481 }
 0x337   :  { %1513 = vset.pattern.permute.xlu2 %v1615_v62 }
 0x33e   :  { %599 = vperm.xlu2 %1513, %v1776_v41  }
 0x346   :  { %1523 = vset.pattern.permute.xlu2 %v1616_v63 }
 0x347   :  { %886 = vperm.xlu2 %1523, %v1789_v58  }
 0x34f   :  { %1525 = vset.pattern.permute.xlu2 %v1618_v52 }
 0x366   :  { %v1811_v6 = vpop.trf.xlu2 }
 0x367   :  { %v327_v8 = vperm.slane %v1811_v6, 0  ;;  %v467_v9 = vperm.slane %v1811_v6, 1  ;;  %v602_v12 = vperm.slane %v1811_v6, 2 }
 0x369   :  { %v328_v10 = vadd.f32 %v327_v8, %v320_v59  ;;  %v329_v11 = vadd.f32 %v327_v8, %v325_v2  ;;  %v468_v14 = vadd.f32 %v467_v9, %v461_v5  ;;  %v469_v15 = vadd.f32 %v467_v9, %v465_v60  ;;  %v1854_v2 = vld [vmem:[%s2084_s6] ss:$0 sm:$0xff]  ;;  %s1619_s6 = smov 96  }
 0x36b   :  { %vm330_vm6 = vcmp.gt.f32.partialorder %v328_v10, 0.0  ;;  %vm331_vm7 = vcmp.gt.f32.partialorder %v329_v11, 0.0  ;;  %v332_v16 = vmul.f32 0.2, %v328_v10  ;;  %v333_v17 = vmul.f32 0.2, %v329_v11 }
 0x36c   :  { %v472_v25 = vmul.f32 0.2, %v468_v14  ;;  %v473_v26 = vmul.f32 0.2, %v469_v15  ;;  %vm470_vm10 = vcmp.gt.f32.partialorder %v468_v14, 0.0  ;;  %vm471_vm11 = vcmp.gt.f32.partialorder %v469_v15, 0.0 }
 0x36d   :  { %v334_v21 = vsel %vm330_vm6, %v328_v10, %v332_v16  ;;  %v335_v22 = vsel %vm331_vm7, %v329_v11, %v333_v17 }
 0x36e   :  { %v346_v23 = vsub.f32 %v334_v21, %v339_v3  ;;  %v347_v24 = vsub.f32 %v335_v22, %v344_v4  ;;  %v474_v31 = vsel %vm470_vm10, %v468_v14, %v472_v25  ;;  %v475_v32 = vsel %vm471_vm11, %v469_v15, %v473_v26  ;;  %v250_v25 = vld [vmem:[%s2086_s9 + $0x8] sm:$0xff] }
 0x36f   :  { %v484_v34 = vsub.f32 %v474_v31, %v478_v18  ;;  %v485_v35 = vsub.f32 %v475_v32, %v482_v33 }
 0x370   :  { %v348_v27 = vsel %vm1818_vm8, %v346_v23, -1e+30  ;;  %v349_v28 = vsel %vm1822_vm9, %v347_v24, -1e+30 }
 0x371   :  { %v350_v29 = vmul.f32 1.442695, %v348_v27  ;;  %v352_v30 = vmul.f32 1.442695, %v349_v28  ;;  %v486_v39 = vsel %vm1818_vm8, %v484_v34, -1e+30 }
 0x372   :  { %v487_v43 = vsel %vm1822_vm9, %v485_v35, -1e+30  ;;  %v488_v44 = vmul.f32 1.442695, %v486_v39 }
 0x373   :  { %1546 = vpow2.f32 %v350_v29  ;;  %v490_v45 = vmul.f32 1.442695, %v487_v43  ;;  %v249_v29 = vld [vmem:[%s2086_s9] sm:$0xff] }
 0x374   :  { %1548 = vpow2.f32 %v352_v30 }
 0x375   :  { %1550 = vpow2.f32 %v488_v44 }
 0x376   :  { %1552 = vpow2.f32 %v490_v45 }
 0x379   :  { %v1547_v36 = vpop.eup %1546 }
 0x37a   :  { %v1549_v37 = vpop.eup %1548 }
 0x37b   :  { %v354_v42 = vpack.c.bf16 %v1549_v37, %v1547_v36  ;;  %v1551_v47 = vpop.eup %1550 }
 0x37c   :  { %v1553_v48 = vpop.eup %1552 }
 0x37d   :  { %1452 = vmatmul.msk.bf16.vlgmr.msrb.gmra.mxu2 %vm101_vm2, %v354_v42  ;;  %1453 = vmatmul.msk.bf16.vlgmr.msra.gmra.mxu0 %vm101_vm2, %v354_v42  ;;  %v492_v49 = vpack.c.bf16 %v1553_v48, %v1551_v47 }
 0x37e   :  { %655 = vmatpush.bf16.msrb.mxu2 %v1617_v1 }
 0x38d   :  { %1456 = vmatmul.msk.bf16.vlgmr.msra.gmra.mxu2 %vm101_vm2, %v492_v49  ;;  %1457 = vmatmul.msk.bf16.vlgmr.msrb.gmra.mxu0 %vm101_vm2, %v492_v49 }
 0x398   :  { %v600_v10 = vpop.permute.xlu2 %599 }
 0x399   :  { %v604_v16 = vadd.f32 %v602_v12, %v600_v10  ;;  %v252_v10 = vld [vmem:[%s2086_s9 + $0x18] sm:$0xff] }
 0x39a   :  { %587 = vmatpush.msrb.mxu3 %v252_v10 }
 0x39b   :  { %v608_v22 = vmul.f32 0.2, %v604_v16  ;;  %vm606_vm12 = vcmp.gt.f32.partialorder %v604_v16, 0.0 }
 0x39d   :  { %v610_v27 = vsel %vm606_vm12, %v604_v16, %v608_v22 }
 0x3fa   :  { %v387_v53 = vpop.f32.mrf.mxu0 }
 0x3fb   :  { %v392_v54 = vmax.f32 %v387_v53, 1e-30 }
 0x3fd   :  { %1554 = vrcp.f32 %v392_v54 }
 0x402   :  { %v389_v55 = vpop.f32.mrf.mxu0 }
 0x403   :  { %v1555_v56 = vpop.eup %1554  ;;  %v393_v59 = vmax.f32 %v389_v55, 1e-30 }
 0x404   :  { %398 = vperm.xlu0 %1511, %v1555_v56  }
 0x405   :  { %1556 = vrcp.f32 %v393_v59  ;;  %v1881_v59 = vpop.f32.mrf.mxu1 }
 0x40a   :  { %v522_v61 = vpop.f32.mrf.mxu0 }
 0x40b   :  { %v1557_v60 = vpop.eup %1556  ;;  %v527_v5 = vmax.f32 %v522_v61, 1e-30 }
 0x40c   :  { %1514 = vset.pattern.permute.xlu0 %v1615_v62  ;;  %403 = vperm.xlu1 %1510, %v1557_v60  }
 0x40d   :  { %616 = vperm.xlu0 %1514, %v1789_v58  }
 0x412   :  { %v524_v3 = vpop.f32.mrf.mxu0 }
 0x413   :  { %v528_v4 = vmax.f32 %v524_v3, 1e-30 }
 0x414   :  { %1512 = vset.pattern.permute.xlu1 %v1615_v62  ;;  %v373_v62 = vpop.f32.mrf.mxu2 }
 0x415   :  { %595 = vperm.xlu1 %1512, %v1774_v40   ;;  %543 = vrot.lane.b32.xlu0 %v1854_v2, %s1614_s30  ;;  %1558 = vrcp.f32 %v528_v4 }
 0x416   :  { %1516 = vset.pattern.permute.xlu0 %v1618_v52  ;;  %1560 = vrcp.f32 %v527_v5 }
 0x41b   :  { %v1559_v7 = vpop.eup %1558 }
 0x41c   :  { %v1561_v8 = vpop.eup %1560  ;;  %v375_v13 = vpop.f32.mrf.mxu2 }
 0x41d   :  { %612 = vperm.xlu1 %1512, %v1787_v57  }
 0x424   :  { %v508_v32 = vpop.f32.mrf.mxu2 }
 0x425   :  { %1515 = vset.pattern.permute.xlu1 %v1618_v52 }
 0x426   :  { %538 = vperm.xlu1 %1515, %v1559_v7  }
 0x42c   :  { %v510_v43 = vpop.f32.mrf.mxu2 }
 0x42e   :  { %533 = vperm.xlu1 %1515, %v1561_v8  }
 0x436   :  { %628 = vrot.lane.b32.xlu1 %v1771_v38, %s1619_s6 }
 0x476   :  { %v399_v9 = vpop.permute.xlu0 %398 }
 0x477   :  { %v406_v11 = vmul.f32 %v399_v9, %v373_v62  ;;  %v1620_v9 = vmov 11  }
 0x479   :  { %v411_v17 = vadd.f32 %v1854_v2, %v406_v11  ;;  %v251_v11 = vld [vmem:[%s2086_s9 + $0x10] sm:$0xff] }
 0x47a   :  { %588 = vmatpush.msrb.mxu3 %v251_v11  ;;  %v1623_v11 = vmov 13  }
 0x47b   :  { %v413_v23 = vmax.f32 %v411_v17, 0.0 }
 0x47e   :  { %v404_v14 = vpop.permute.xlu1 %403 }
 0x47f   :  { %v407_v15 = vmul.f32 %v404_v14, %v375_v13  ;;  %v617_v24 = vpop.permute.xlu0 %616 }
 0x480   :  { %v620_v30 = vsub.f32 %v610_v27, %v617_v24  ;;  %v737_v27 = vperm.slane %v1811_v6, 3 }
 0x481   :  { %v412_v18 = vadd.f32 %v1854_v2, %v407_v15 }
 0x482   :  { %v622_v33 = vsel %vm1822_vm9, %v620_v30, -1e+30 }
 0x483   :  { %v414_v21 = vmax.f32 %v412_v18, 0.0  ;;  %v625_v36 = vmul.f32 1.442695, %v622_v33 }
 0x485   :  { %429 = vmatpush.msra.mxu1 %v414_v21  ;;  %1562 = vpow2.f32 %v625_v36 }
 0x487   :  { %v596_v26 = vpop.permute.xlu1 %595  ;;  %430 = vmatpush.msra.mxu1 %v413_v23  ;;  %v544_v45 = vpop.permute.xlu0 %543 }
 0x488   :  { %v603_v28 = vadd.f32 %v602_v12, %v596_v26  ;;  %1454 = vmatmul.msk.f32.vlgmr.msra.gmra.mxu1 %vm101_vm2, %v1805_v0 }
 0x489   :  { %452 = vmatpush.msrb.mxu1 %v250_v25 }
 0x48a   :  { %v607_v31 = vmul.f32 0.2, %v603_v28  ;;  %vm605_vm13 = vcmp.gt.f32.partialorder %v603_v28, 0.0 }
 0x48b   :  { %453 = vmatpush.msrb.mxu1 %v249_v29  ;;  %v1563_v47 = vpop.eup %1562 }
 0x48c   :  { %v609_v34 = vsel %vm605_vm13, %v603_v28, %v607_v31 }
 0x48f   :  { %v613_v35 = vpop.permute.xlu1 %612 }
 0x490   :  { %v619_v37 = vsub.f32 %v609_v34, %v613_v35 }
 0x492   :  { %v621_v39 = vsel %vm1818_vm8, %v619_v37, -1e+30 }
 0x493   :  { %v623_v42 = vmul.f32 1.442695, %v621_v39 }
 0x495   :  { %1564 = vpow2.f32 %v623_v42 }
 0x498   :  { %v539_v44 = vpop.permute.xlu1 %538 }
 0x499   :  { %v542_v46 = vmul.f32 %v539_v44, %v510_v43 }
 0x49b   :  { %v1565_v48 = vpop.eup %1564  ;;  %v547_v49 = vadd.f32 %v544_v45, %v542_v46 }
 0x49c   :  { %v627_v50 = vpack.c.bf16 %v1563_v47, %v1565_v48 }
 0x49d   :  { %v549_v51 = vmax.f32 %v547_v49, 0.0 }
 0x49e   :  { %1461 = vmatmul.msk.bf16.vlgmr.msrb.gmra.mxu2 %vm101_vm2, %v627_v50 }
 0x49f   :  { %564 = vmatpush.msra.mxu1 %v549_v51  ;;  %v254_v51 = vld [vmem:[%s2086_s9 + $0x28] sm:$0xff] }
 0x4a0   :  { %v534_v53 = vpop.permute.xlu1 %533  ;;  %722 = vmatpush.msra.mxu0 %v254_v51 }
 0x4a1   :  { %v541_v54 = vmul.f32 %v534_v53, %v508_v32  ;;  %v1544_v53 = vld [vmem:[%s2085_s10] ss:$0 sm:$0xff]  ;;  %s1622_s10 = smov 64  }
 0x4a3   :  { %v546_v55 = vadd.f32 %v544_v45, %v541_v54  ;;  %v315_v54 = vadd.f32 %v1544_v53, %v1881_v59 }
 0x4a5   :  { %v548_v56 = vmax.f32 %v546_v55, 0.0 }
 0x4a7   :  { %565 = vmatpush.msra.mxu1 %v548_v56 }
 0x4a8   :  { %v629_v61 = vpop.permute.xlu1 %628 }
 0x505   :  { %v432_v60 = vpop.f32.mrf.mxu1 }
 0x506   :  { %1455 = vmatmul.msk.f32.vlgmr.msrb.gmra.mxu1 %vm101_vm2, %v432_v60 }
 0x507   :  { %641 = vmatpush.bf16.msrb.mxu1 %v629_v61  ;;  %v253_v61 = vld [vmem:[%s2086_s9 + $0x20] sm:$0xff] }
 0x508   :  { %723 = vmatpush.msra.mxu0 %v253_v61 }
 0x50a   :  { %790 = vmatpush.bf16.msrb.mxu0 %v1617_v1 }
 0x50e   :  { %1458 = vmatmul.msk.f32.vlgmr.msra.gmra.mxu1 %vm101_vm2, %v1805_v0 }
 0x516   :  { %1460 = vmatmul.msk.bf16.vlgmr.msrb.gmra.mxu1 %vm101_vm2, %v627_v50 }
 0x521   :  { %v657_v3 = vpop.f32.mrf.mxu2 }
 0x522   :  { %v662_v4 = vmax.f32 %v657_v3, 1e-30 }
 0x524   :  { %1566 = vrcp.f32 %v662_v4 }
 0x529   :  { %v659_v5 = vpop.f32.mrf.mxu2 }
 0x52a   :  { %v1567_v7 = vpop.eup %1566  ;;  %v663_v8 = vmax.f32 %v659_v5, 1e-30 }
 0x52b   :  { %668 = vperm.xlu1 %1515, %v1567_v7  }
 0x52c   :  { %1568 = vrcp.f32 %v663_v8 }
 0x532   :  { %v1569_v62 = vpop.eup %1568 }
 0x533   :  { %678 = vrot.lane.b32.xlu1 %v1854_v2, %s1619_s6  ;;  %673 = vperm.xlu0 %1516, %v1569_v62  }
 0x534   :  { %1518 = vset.pattern.permute.xlu1 %v1620_v9 }
 0x53b   :  { %734 = vperm.xlu1 %1518, %v1776_v41   ;;  %1517 = vset.pattern.permute.xlu0 %v1620_v9 }
 0x53c   :  { %730 = vperm.xlu0 %1517, %v1774_v40  }
 0x543   :  { %747 = vperm.xlu1 %1518, %v1787_v57  }
 0x544   :  { %751 = vperm.xlu0 %1517, %v1789_v58  }
 0x54b   :  { %763 = vrot.lane.b32.xlu1 %v1771_v38, %s1621_s23 }
 0x54c   :  { %1520 = vset.pattern.permute.xlu1 %v1618_v52  ;;  %1519 = vset.pattern.permute.xlu0 %v1618_v52 }
 0x583   :  { %v455_v12 = vpop.f32.mrf.mxu1 }
 0x584   :  { %v458_v55 = vadd.f32 %v455_v12, %v315_v54  ;;  %v1627_v12 = vmov 15  }
 0x58b   :  { %v567_v13 = vpop.f32.mrf.mxu1 }
 0x58c   :  { %1459 = vmatmul.msk.f32.vlgmr.msrb.gmra.mxu3 %vm101_vm2, %v567_v13 }
 0x593   :  { %v643_v14 = vpop.f32.mrf.mxu1 }
 0x59b   :  { %v645_v16 = vpop.f32.mrf.mxu1 }
 0x59d   :  { %v669_v15 = vpop.permute.xlu1 %668 }
 0x59e   :  { %v676_v21 = vmul.f32 %v669_v15, %v643_v14 }
 0x5a5   :  { %v679_v17 = vpop.permute.xlu1 %678  ;;  %v674_v18 = vpop.permute.xlu0 %673 }
 0x5a6   :  { %v677_v22 = vmul.f32 %v674_v18, %v645_v16  ;;  %v681_v23 = vadd.f32 %v679_v17, %v676_v21 }
 0x5a8   :  { %v682_v24 = vadd.f32 %v679_v17, %v677_v22  ;;  %v683_v26 = vmax.f32 %v681_v23, 0.0 }
 0x5aa   :  { %v684_v25 = vmax.f32 %v682_v24, 0.0 }
 0x5ac   :  { %699 = vmatpush.msra.mxu3 %v684_v25 }
 0x5ad   :  { %v735_v28 = vpop.permute.xlu1 %734 }
 0x5ae   :  { %v739_v29 = vadd.f32 %v737_v27, %v735_v28  ;;  %v731_v30 = vpop.permute.xlu0 %730  ;;  %700 = vmatpush.msra.mxu3 %v683_v26  ;;  %v872_v26 = vperm.slane %v1811_v6, 4 }
 0x5af   :  { %v738_v31 = vadd.f32 %v737_v27, %v731_v30  ;;  %1462 = vmatmul.msk.f32.vlgmr.msra.gmra.mxu3 %vm101_vm2, %v1805_v0 }
 0x5b0   :  { %v743_v33 = vmul.f32 0.2, %v739_v29  ;;  %vm741_vm15 = vcmp.gt.f32.partialorder %v739_v29, 0.0 }
 0x5b1   :  { %v742_v32 = vmul.f32 0.2, %v738_v31  ;;  %vm740_vm14 = vcmp.gt.f32.partialorder %v738_v31, 0.0 }
 0x5b2   :  { %v745_v37 = vsel %vm741_vm15, %v739_v29, %v743_v33 }
 0x5b3   :  { %v744_v35 = vsel %vm740_vm14, %v738_v31, %v742_v32  ;;  %v887_v32 = vpop.permute.xlu2 %886 }
 0x5b5   :  { %v748_v34 = vpop.permute.xlu1 %747 }
 0x5b6   :  { %v754_v36 = vsub.f32 %v744_v35, %v748_v34  ;;  %v752_v39 = vpop.permute.xlu0 %751 }
 0x5b7   :  { %v755_v42 = vsub.f32 %v745_v37, %v752_v39 }
 0x5b8   :  { %v756_v43 = vsel %vm1818_vm8, %v754_v36, -1e+30 }
 0x5b9   :  { %v758_v44 = vmul.f32 1.442695, %v756_v43  ;;  %v757_v45 = vsel %vm1822_vm9, %v755_v42, -1e+30 }
 0x5ba   :  { %v760_v46 = vmul.f32 1.442695, %v757_v45 }
 0x5bb   :  { %1570 = vpow2.f32 %v758_v44 }
 0x5bc   :  { %1572 = vpow2.f32 %v760_v46 }
 0x5bd   :  { %v764_v47 = vpop.permute.xlu1 %763 }
 0x5be   :  { %776 = vmatpush.bf16.msrb.mxu3 %v764_v47 }
 0x5c1   :  { %v1571_v48 = vpop.eup %1570 }
 0x5c2   :  { %v1573_v49 = vpop.eup %1572 }
 0x5c3   :  { %v762_v50 = vpack.c.bf16 %v1573_v49, %v1571_v48  ;;  %v256_v49 = vld [vmem:[%s2086_s9 + $0x38] sm:$0xff] }
 0x5c4   :  { %857 = vmatpush.msra.mxu2 %v256_v49 }
 0x5c5   :  { %1464 = vmatmul.msk.bf16.vlgmr.msrb.gmra.mxu3 %vm101_vm2, %v762_v50 }
 0x60f   :  { %v590_v56 = vpop.f32.mrf.mxu3 }
 0x610   :  { %v593_v60 = vadd.f32 %v590_v56, %v458_v55 }
 0x632   :  { %v702_v3 = vpop.f32.mrf.mxu3 }
 0x633   :  { %1463 = vmatmul.msk.f32.vlgmr.msra.gmra.mxu0 %vm101_vm2, %v702_v3 }
 0x63b   :  { %1465 = vmatmul.msk.bf16.vlgmr.msrb.gmra.mxu0 %vm101_vm2, %v762_v50  ;;  %v255_v50 = vld [vmem:[%s2086_s9 + $0x30] sm:$0xff] }
 0x63c   :  { %858 = vmatpush.msra.mxu2 %v255_v50 }
 0x63e   :  { %925 = vmatpush.bf16.msrb.mxu2 %v1617_v1 }
 0x648   :  { %v778_v13 = vpop.f32.mrf.mxu3 }
 0x650   :  { %v780_v15 = vpop.f32.mrf.mxu3 }
 0x6b0   :  { %v725_v4 = vpop.f32.mrf.mxu0 }
 0x6b1   :  { %v1925_v5 = vadd.f32 %v725_v4, %v593_v60 }
 0x6b8   :  { %v792_v7 = vpop.f32.mrf.mxu0 }
 0x6b9   :  { %v797_v59 = vmax.f32 %v792_v7, 1e-30 }
 0x6bb   :  { %1574 = vrcp.f32 %v797_v59 }
 0x6c0   :  { %v794_v8 = vpop.f32.mrf.mxu0 }
 0x6c1   :  { %v1575_v62 = vpop.eup %1574  ;;  %v798_v9 = vmax.f32 %v794_v8, 1e-30 }
 0x6c2   :  { %803 = vperm.xlu1 %1520, %v1575_v62  }
 0x6c3   :  { %1576 = vrcp.f32 %v798_v9 }
 0x6c9   :  { %v1577_v10 = vpop.eup %1576 }
 0x6ca   :  { %813 = vrot.lane.b32.xlu1 %v1854_v2, %s1621_s23  ;;  %808 = vperm.xlu0 %1519, %v1577_v10   ;;  %v258_v10 = vld [vmem:[%s2086_s9 + $0x48] sm:$0xff]  ;;  %s1628_s23 = smov 16  }
 0x6cb   :  { %1522 = vset.pattern.permute.xlu1 %v1616_v63  ;;  %992 = vmatpush.msra.mxu0 %v258_v10 }
 0x6d2   :  { %869 = vperm.xlu1 %1522, %v1776_v41   ;;  %1521 = vset.pattern.permute.xlu0 %v1616_v63  ;;  %v1625_v63 = vmov 14  }
 0x6d3   :  { %865 = vperm.xlu0 %1521, %v1774_v40  }
 0x6da   :  { %882 = vperm.xlu1 %1522, %v1787_v57  }
 0x6db   :  { %898 = vrot.lane.b32.xlu0 %v1771_v38, %s1622_s10 }
 0x6dc   :  { %1528 = vset.pattern.permute.xlu0 %v1623_v11 }
 0x6e2   :  { %1524 = vset.pattern.permute.xlu1 %v1618_v52 }
 0x6e3   :  { %948 = vrot.lane.b32.xlu0 %v1854_v2, %s1622_s10 }
 0x6eb   :  { %1017 = vperm.xlu0 %1528, %v1787_v57  }
 0x6f3   :  { %1083 = vrot.lane.b32.xlu0 %v1854_v2, %s1624_s15 }
 0x6f4   :  { %1533 = vset.pattern.permute.xlu0 %v1625_v63 }
 0x6fb   :  { %1152 = vperm.xlu0 %1533, %v1787_v57  }
 0x703   :  { %1218 = vrot.lane.b32.xlu0 %v1854_v2, %s1626_s2 }
 0x704   :  { %1538 = vset.pattern.permute.xlu0 %v1627_v12 }
 0x70b   :  { %1287 = vperm.xlu0 %1538, %v1787_v57  }
 0x713   :  { %1541 = vset.pattern.permute.xlu0 %v1618_v52 }
 0x714   :  { %1353 = vrot.lane.b32.xlu0 %v1854_v2, %s1628_s23 }
 0x734   :  { %v804_v14 = vpop.permute.xlu1 %803 }
 0x735   :  { %v811_v18 = vmul.f32 %v804_v14, %v778_v13 }
 0x73c   :  { %v814_v16 = vpop.permute.xlu1 %813  ;;  %v809_v17 = vpop.permute.xlu0 %808 }
 0x73d   :  { %v812_v21 = vmul.f32 %v809_v17, %v780_v15  ;;  %v816_v22 = vadd.f32 %v814_v16, %v811_v18  ;;  %v1007_v18 = vperm.slane %v1811_v6, 5 }
 0x73f   :  { %v817_v23 = vadd.f32 %v814_v16, %v812_v21  ;;  %v818_v25 = vmax.f32 %v816_v22, 0.0 }
 0x741   :  { %v819_v24 = vmax.f32 %v817_v23, 0.0 }
 0x743   :  { %834 = vmatpush.msra.mxu1 %v819_v24 }
 0x744   :  { %v870_v27 = vpop.permute.xlu1 %869 }
 0x745   :  { %v874_v28 = vadd.f32 %v872_v26, %v870_v27  ;;  %835 = vmatpush.msra.mxu1 %v818_v25  ;;  %v866_v57 = vpop.permute.xlu0 %865 }
 0x746   :  { %v873_v29 = vadd.f32 %v872_v26, %v866_v57  ;;  %1466 = vmatmul.msk.f32.vlgmr.msra.gmra.mxu1 %vm101_vm2, %v1805_v0 }
 0x747   :  { %vm876_vm0 = vcmp.gt.f32.partialorder %v874_v28, 0.0  ;;  %v878_v30 = vmul.f32 0.2, %v874_v28 }
 0x748   :  { %v877_v31 = vmul.f32 0.2, %v873_v29  ;;  %vm875_vm1 = vcmp.gt.f32.partialorder %v873_v29, 0.0 }
 0x749   :  { %v880_v33 = vsel %vm876_vm0, %v874_v28, %v878_v30 }
 0x74a   :  { %v890_v34 = vsub.f32 %v880_v33, %v887_v32  ;;  %v879_v37 = vsel %vm875_vm1, %v873_v29, %v877_v31 }
 0x74c   :  { %v892_v35 = vsel %vm1822_vm9, %v890_v34, -1e+30  ;;  %v883_v36 = vpop.permute.xlu1 %882 }
 0x74d   :  { %v895_v39 = vmul.f32 1.442695, %v892_v35  ;;  %v889_v42 = vsub.f32 %v879_v37, %v883_v36  ;;  %v899_v43 = vpop.permute.xlu0 %898 }
 0x74e   :  { %911 = vmatpush.bf16.msrb.mxu1 %v899_v43 }
 0x74f   :  { %v891_v44 = vsel %vm1818_vm8, %v889_v42, -1e+30  ;;  %1578 = vpow2.f32 %v895_v39  ;;  %v257_v42 = vld [vmem:[%s2086_s9 + $0x40] sm:$0xff] }
 0x750   :  { %v893_v45 = vmul.f32 1.442695, %v891_v44  ;;  %993 = vmatpush.msra.mxu0 %v257_v42 }
 0x752   :  { %1580 = vpow2.f32 %v893_v45  ;;  %1060 = vmatpush.bf16.msrb.mxu0 %v1617_v1 }
 0x755   :  { %v1579_v46 = vpop.eup %1578  ;;  %v949_v13 = vpop.permute.xlu0 %948 }
 0x758   :  { %v1581_v47 = vpop.eup %1580 }
 0x759   :  { %v897_v48 = vpack.c.bf16 %v1579_v46, %v1581_v47 }
 0x75b   :  { %1468 = vmatmul.msk.bf16.vlgmr.msrb.gmra.mxu1 %vm101_vm2, %v897_v48 }
 0x75d   :  { %v1018_v27 = vpop.permute.xlu0 %1017 }
 0x7c3   :  { %v837_v51 = vpop.f32.mrf.mxu1 }
 0x7c4   :  { %1467 = vmatmul.msk.f32.vlgmr.msra.gmra.mxu2 %vm101_vm2, %v837_v51 }
 0x7cc   :  { %1469 = vmatmul.msk.bf16.vlgmr.msrb.gmra.mxu2 %vm101_vm2, %v897_v48 }
 0x847   :  { %v860_v53 = vpop.f32.mrf.mxu2 }
 0x848   :  { %v1966_v54 = vadd.f32 %v860_v53, %v1925_v5  ;;  %v913_v5 = vpop.f32.mrf.mxu1 }
 0x84f   :  { %v927_v55 = vpop.f32.mrf.mxu2 }
 0x850   :  { %v932_v56 = vmax.f32 %v927_v55, 1e-30  ;;  %v915_v59 = vpop.f32.mrf.mxu1 }
 0x852   :  { %1582 = vrcp.f32 %v932_v56 }
 0x857   :  { %v929_v60 = vpop.f32.mrf.mxu2 }
 0x858   :  { %v1583_v61 = vpop.eup %1582  ;;  %v933_v3 = vmax.f32 %v929_v60, 1e-30 }
 0x859   :  { %938 = vperm.xlu2 %1525, %v1583_v61  }
 0x85a   :  { %1584 = vrcp.f32 %v933_v3 }
 0x860   :  { %v1585_v4 = vpop.eup %1584 }
 0x861   :  { %1527 = vset.pattern.permute.xlu2 %v1623_v11  ;;  %943 = vperm.xlu1 %1524, %v1585_v4   ;;  %v1084_v4 = vpop.permute.xlu0 %1083 }
 0x862   :  { %1004 = vperm.xlu2 %1527, %v1776_v41  }
 0x869   :  { %1526 = vset.pattern.permute.xlu1 %v1623_v11 }
 0x86a   :  { %1033 = vrot.lane.b32.xlu2 %v1771_v38, %s1624_s15  ;;  %1000 = vperm.xlu1 %1526, %v1774_v40  }
 0x86b   :  { %1530 = vset.pattern.permute.xlu2 %v1618_v52 }
 0x872   :  { %1021 = vperm.xlu1 %1526, %v1789_v58  }
 0x87a   :  { %1529 = vset.pattern.permute.xlu1 %v1618_v52 }
 0x8b3   :  { %v939_v7 = vpop.permute.xlu2 %938 }
 0x8b4   :  { %v946_v8 = vmul.f32 %v939_v7, %v913_v5 }
 0x8b6   :  { %v951_v14 = vadd.f32 %v949_v13, %v946_v8 }
 0x8b8   :  { %v953_v17 = vmax.f32 %v951_v14, 0.0 }
 0x8bc   :  { %v1005_v62 = vpop.permute.xlu2 %1004 }
 0x8bd   :  { %v1009_v21 = vadd.f32 %v1007_v18, %v1005_v62  ;;  %v1142_v62 = vperm.slane %v1811_v6, 6 }
 0x8bf   :  { %v1013_v26 = vmul.f32 0.2, %v1009_v21  ;;  %vm1011_vm4 = vcmp.gt.f32.partialorder %v1009_v21, 0.0 }
 0x8c1   :  { %v1015_v30 = vsel %vm1011_vm4, %v1009_v21, %v1013_v26 }
 0x8c4   :  { %v1034_v23 = vpop.permute.xlu2 %1033 }
 0x8d3   :  { %v944_v9 = vpop.permute.xlu1 %943 }
 0x8d4   :  { %v947_v11 = vmul.f32 %v944_v9, %v915_v59 }
 0x8d6   :  { %v952_v15 = vadd.f32 %v949_v13, %v947_v11 }
 0x8d8   :  { %v954_v16 = vmax.f32 %v952_v15, 0.0 }
 0x8da   :  { %969 = vmatpush.msra.mxu3 %v954_v16  ;;  %v1153_v16 = vpop.permute.xlu0 %1152 }
 0x8dc   :  { %v1001_v22 = vpop.permute.xlu1 %1000  ;;  %970 = vmatpush.msra.mxu3 %v953_v17 }
 0x8dd   :  { %v1008_v24 = vadd.f32 %v1007_v18, %v1001_v22  ;;  %1470 = vmatmul.msk.f32.vlgmr.msra.gmra.mxu3 %vm101_vm2, %v1805_v0 }
 0x8de   :  { %1046 = vmatpush.bf16.msrb.mxu3 %v1034_v23 }
 0x8df   :  { %vm1010_vm3 = vcmp.gt.f32.partialorder %v1008_v24, 0.0  ;;  %v1012_v25 = vmul.f32 0.2, %v1008_v24 }
 0x8e1   :  { %v1014_v28 = vsel %vm1010_vm3, %v1008_v24, %v1012_v25 }
 0x8e2   :  { %v1024_v57 = vsub.f32 %v1014_v28, %v1018_v27 }
 0x8e4   :  { %v1026_v29 = vsel %vm1818_vm8, %v1024_v57, -1e+30  ;;  %v1022_v31 = vpop.permute.xlu1 %1021 }
 0x8e5   :  { %v1028_v32 = vmul.f32 1.442695, %v1026_v29  ;;  %v1025_v33 = vsub.f32 %v1015_v30, %v1022_v31  ;;  %v259_v29 = vld [vmem:[%s2086_s9 + $0x50] sm:$0xff] }
 0x8e7   :  { %v1027_v34 = vsel %vm1822_vm9, %v1025_v33, -1e+30  ;;  %1586 = vpow2.f32 %v1028_v32 }
 0x8e8   :  { %v1030_v35 = vmul.f32 1.442695, %v1027_v34 }
 0x8ea   :  { %1588 = vpow2.f32 %v1030_v35 }
 0x8ed   :  { %v1587_v36 = vpop.eup %1586 }
 0x8f0   :  { %v1589_v37 = vpop.eup %1588 }
 0x8f1   :  { %v1032_v39 = vpack.c.bf16 %v1589_v37, %v1587_v36 }
 0x8f3   :  { %1472 = vmatmul.msk.bf16.vlgmr.msrb.gmra.mxu3 %vm101_vm2, %v1032_v39 }
 0x960   :  { %v972_v43 = vpop.f32.mrf.mxu3 }
 0x961   :  { %1471 = vmatmul.msk.f32.vlgmr.msra.gmra.mxu0 %vm101_vm2, %v972_v43 }
 0x969   :  { %1473 = vmatmul.msk.bf16.vlgmr.msrb.gmra.mxu0 %vm101_vm2, %v1032_v39 }
 0x976   :  { %v1048_v53 = vpop.f32.mrf.mxu3 }
 0x97e   :  { %v1050_v55 = vpop.f32.mrf.mxu3 }
 0x9de   :  { %v995_v44 = vpop.f32.mrf.mxu0 }
 0x9df   :  { %v1995_v45 = vadd.f32 %v995_v44, %v1966_v54 }
 0x9e6   :  { %v1062_v46 = vpop.f32.mrf.mxu0 }
 0x9e7   :  { %v1067_v47 = vmax.f32 %v1062_v46, 1e-30 }
 0x9e9   :  { %1590 = vrcp.f32 %v1067_v47 }
 0x9ee   :  { %v1064_v48 = vpop.f32.mrf.mxu0 }
 0x9ef   :  { %v1591_v49 = vpop.eup %1590  ;;  %v1068_v50 = vmax.f32 %v1064_v48, 1e-30 }
 0x9f0   :  { %1073 = vperm.xlu2 %1530, %v1591_v49  }
 0x9f1   :  { %1592 = vrcp.f32 %v1068_v50 }
 0x9f7   :  { %v1593_v51 = vpop.eup %1592 }
 0x9f8   :  { %1532 = vset.pattern.permute.xlu2 %v1625_v63  ;;  %1078 = vperm.xlu1 %1529, %v1593_v51  }
 0x9f9   :  { %1139 = vperm.xlu2 %1532, %v1776_v41  }
 0xa00   :  { %1531 = vset.pattern.permute.xlu1 %v1625_v63  ;;  %v260_v63 = vld [vmem:[%s2086_s9 + $0x58] sm:$0xff] }
 0xa01   :  { %1168 = vrot.lane.b32.xlu2 %v1771_v38, %s1626_s2  ;;  %1135 = vperm.xlu1 %1531, %v1774_v40  }
 0xa02   :  { %1535 = vset.pattern.permute.xlu2 %v1618_v52  ;;  %1127 = vmatpush.msra.mxu2 %v260_v63 }
 0xa04   :  { %1128 = vmatpush.msra.mxu2 %v259_v29 }
 0xa06   :  { %1195 = vmatpush.bf16.msrb.mxu2 %v1617_v1 }
 0xa09   :  { %1156 = vperm.xlu1 %1531, %v1789_v58  }
 0xa11   :  { %1534 = vset.pattern.permute.xlu1 %v1618_v52 }
 0xa4a   :  { %v1074_v54 = vpop.permute.xlu2 %1073 }
 0xa4b   :  { %v1081_v56 = vmul.f32 %v1074_v54, %v1048_v53  ;;  %v1610_v54 = vld [vmem:[%s2082_s7] sm:$0x3] }
 0xa4d   :  { %v1086_v5 = vadd.f32 %v1084_v4, %v1081_v56 }
 0xa4f   :  { %v1088_v8 = vmax.f32 %v1086_v5, 0.0 }
 0xa53   :  { %v1140_v60 = vpop.permute.xlu2 %1139 }
 0xa54   :  { %v1144_v9 = vadd.f32 %v1142_v62, %v1140_v60 }
 0xa56   :  { %v1148_v15 = vmul.f32 0.2, %v1144_v9  ;;  %vm1146_vm6 = vcmp.gt.f32.partialorder %v1144_v9, 0.0 }
 0xa58   :  { %v1150_v22 = vsel %vm1146_vm6, %v1144_v9, %v1148_v15 }
 0xa5b   :  { %v1169_v11 = vpop.permute.xlu2 %1168 }
 0xa6a   :  { %v1079_v61 = vpop.permute.xlu1 %1078 }
 0xa6b   :  { %v1082_v3 = vmul.f32 %v1079_v61, %v1050_v55 }
 0xa6d   :  { %v1087_v7 = vadd.f32 %v1084_v4, %v1082_v3 }
 0xa6f   :  { %v1089_v59 = vmax.f32 %v1087_v7, 0.0 }
 0xa71   :  { %1104 = vmatpush.msra.mxu1 %v1089_v59 }
 0xa73   :  { %v1136_v10 = vpop.permute.xlu1 %1135  ;;  %1105 = vmatpush.msra.mxu1 %v1088_v8 }
 0xa74   :  { %v1143_v13 = vadd.f32 %v1142_v62, %v1136_v10  ;;  %1474 = vmatmul.msk.f32.vlgmr.msra.gmra.mxu1 %vm101_vm2, %v1805_v0 }
 0xa75   :  { %1181 = vmatpush.bf16.msrb.mxu1 %v1169_v11 }
 0xa76   :  { %vm1145_vm5 = vcmp.gt.f32.partialorder %v1143_v13, 0.0  ;;  %v1147_v14 = vmul.f32 0.2, %v1143_v13 }
 0xa78   :  { %v1149_v17 = vsel %vm1145_vm5, %v1143_v13, %v1147_v14 }
 0xa79   :  { %v1159_v18 = vsub.f32 %v1149_v17, %v1153_v16 }
 0xa7b   :  { %v1161_v21 = vsel %vm1818_vm8, %v1159_v18, -1e+30  ;;  %v1157_v23 = vpop.permute.xlu1 %1156 }
 0xa7c   :  { %v1163_v24 = vmul.f32 1.442695, %v1161_v21  ;;  %v1160_v25 = vsub.f32 %v1150_v22, %v1157_v23 }
 0xa7e   :  { %v1162_v26 = vsel %vm1822_vm9, %v1160_v25, -1e+30  ;;  %1594 = vpow2.f32 %v1163_v24 }
 0xa7f   :  { %v1165_v27 = vmul.f32 1.442695, %v1162_v26 }
 0xa81   :  { %1596 = vpow2.f32 %v1165_v27 }
 0xa84   :  { %v1595_v0 = vpop.eup %1594 }
 0xa87   :  { %v1597_v28 = vpop.eup %1596 }
 0xa88   :  { %v1167_v57 = vpack.c.bf16 %v1597_v28, %v1595_v0 }
 0xa8a   :  { %1476 = vmatmul.msk.bf16.vlgmr.msrb.gmra.mxu1 %vm101_vm2, %v1167_v57 }
 0xaf1   :  { %v1107_v30 = vpop.f32.mrf.mxu1 }
 0xaf2   :  { %1475 = vmatmul.msk.f32.vlgmr.msra.gmra.mxu2 %vm101_vm2, %v1107_v30 }
 0xafa   :  { %1477 = vmatmul.msk.bf16.vlgmr.msrb.gmra.mxu2 %vm101_vm2, %v1167_v57 }
 0xb07   :  { %v1183_v2 = vpop.f32.mrf.mxu1 }
 0xb0f   :  { %v1185_v43 = vpop.f32.mrf.mxu1 }
 0xb75   :  { %v1130_v31 = vpop.f32.mrf.mxu2 }
 0xb76   :  { %v2025_v32 = vadd.f32 %v1130_v31, %v1995_v45  ;;  %v263_v31 = vld [vmem:[%s2086_s9 + $0x70] sm:$0xff] }
 0xb7d   :  { %v1197_v33 = vpop.f32.mrf.mxu2 }
 0xb7e   :  { %v1202_v34 = vmax.f32 %v1197_v33, 1e-30  ;;  %v1406_v33 = vld [vmem:[%s2087_s11 + $0x8] sm:$0xff] }
 0xb80   :  { %1598 = vrcp.f32 %v1202_v34  ;;  %v1405_v34 = vld [vmem:[%s2087_s11] sm:$0xff] }
 0xb85   :  { %v1199_v35 = vpop.f32.mrf.mxu2 }
 0xb86   :  { %v1599_v36 = vpop.eup %1598  ;;  %v1203_v37 = vmax.f32 %v1199_v35, 1e-30  ;;  %v18_v35 = vstv %s2088_s12 }
 0xb87   :  { %1208 = vperm.xlu2 %1535, %v1599_v36   ;;  %19 = vst [vmem:[#allocation2] sm:$0x1] %v18_v35 }
 0xb88   :  { %1600 = vrcp.f32 %v1203_v37 }
 0xb8e   :  { %v1601_v39 = vpop.eup %1600 }
 0xb8f   :  { %1537 = vset.pattern.permute.xlu2 %v1627_v12  ;;  %1213 = vperm.xlu1 %1534, %v1601_v39  }
 0xb90   :  { %1274 = vperm.xlu2 %1537, %v1776_v41   ;;  %v262_v41 = vld [vmem:[%s2086_s9 + $0x68] sm:$0xff] }
 0xb91   :  { %1262 = vmatpush.msra.mxu0 %v262_v41 }
 0xb93   :  { %1263 = vmatpush.msra.mxu0 %v261_v19 }
 0xb95   :  { %1330 = vmatpush.bf16.msrb.mxu0 %v1617_v1  ;;  %v264_v1 = vld [vmem:[%s2086_s9 + $0x78] sm:$0xff] }
 0xb96   :  { %1397 = vmatpush.msra.mxu2 %v264_v1 }
 0xb97   :  { %1536 = vset.pattern.permute.xlu1 %v1627_v12 }
 0xb98   :  { %1303 = vrot.lane.b32.xlu2 %v1771_v38, %s1628_s23  ;;  %1270 = vperm.xlu1 %1536, %v1774_v40   ;;  %v1219_v38 = vpop.permute.xlu0 %1218 }
 0xb99   :  { %1540 = vset.pattern.permute.xlu2 %v1618_v52  ;;  %1398 = vmatpush.msra.mxu2 %v263_v31 }
 0xba0   :  { %1291 = vperm.xlu1 %1536, %v1789_v58   ;;  %v1277_v58 = vperm.slane %v1811_v6, 7  ;;  %v1288_v60 = vpop.permute.xlu0 %1287 }
 0xba8   :  { %1539 = vset.pattern.permute.xlu1 %v1618_v52  ;;  %v1354_v26 = vpop.permute.xlu0 %1353 }
 0xbe1   :  { %v1209_v42 = vpop.permute.xlu2 %1208 }
 0xbe2   :  { %v1216_v44 = vmul.f32 %v1209_v42, %v1183_v2  ;;  %v1545_v2 = vld [vmem:[#allocation2] ss:$0 sm:$0xff] }
 0xbe4   :  { %v1221_v40 = vadd.f32 %v1219_v38, %v1216_v44 }
 0xbe6   :  { %v1223_v49 = vmax.f32 %v1221_v40, 0.0 }
 0xbea   :  { %v1275_v45 = vpop.permute.xlu2 %1274 }
 0xbeb   :  { %v1279_v52 = vadd.f32 %v1277_v58, %v1275_v45 }
 0xbed   :  { %v1283_v56 = vmul.f32 0.2, %v1279_v52  ;;  %vm1281_vm10 = vcmp.gt.f32.partialorder %v1279_v52, 0.0 }
 0xbef   :  { %v1285_v3 = vsel %vm1281_vm10, %v1279_v52, %v1283_v56 }
 0xbf2   :  { %v1304_v51 = vpop.permute.xlu2 %1303 }
 0xc01   :  { %v1214_v46 = vpop.permute.xlu1 %1213 }
 0xc02   :  { %v1217_v12 = vmul.f32 %v1214_v46, %v1185_v43 }
 0xc04   :  { %v1222_v47 = vadd.f32 %v1219_v38, %v1217_v12 }
 0xc06   :  { %v1224_v48 = vmax.f32 %v1222_v47, 0.0 }
 0xc08   :  { %1239 = vmatpush.msra.mxu3 %v1224_v48 }
 0xc0a   :  { %v1271_v50 = vpop.permute.xlu1 %1270  ;;  %1240 = vmatpush.msra.mxu3 %v1223_v49 }
 0xc0b   :  { %v1278_v53 = vadd.f32 %v1277_v58, %v1271_v50  ;;  %1478 = vmatmul.msk.f32.vlgmr.msra.gmra.mxu3 %vm101_vm2, %v1610_v54 }
 0xc0c   :  { %1316 = vmatpush.bf16.msrb.mxu3 %v1304_v51 }
 0xc0d   :  { %vm1280_vm7 = vcmp.gt.f32.partialorder %v1278_v53, 0.0  ;;  %v1282_v55 = vmul.f32 0.2, %v1278_v53 }
 0xc0f   :  { %v1284_v61 = vsel %vm1280_vm7, %v1278_v53, %v1282_v55 }
 0xc10   :  { %v1294_v6 = vsub.f32 %v1284_v61, %v1288_v60 }
 0xc12   :  { %v1296_v63 = vsel %vm1818_vm8, %v1294_v6, -1e+30  ;;  %v1292_v4 = vpop.permute.xlu1 %1291  ;;  %vm1434_vm8 = vcmask 1024  }
 0xc13   :  { %v1298_v5 = vmul.f32 1.442695, %v1296_v63  ;;  %v1295_v7 = vsub.f32 %v1285_v3, %v1292_v4 }
 0xc15   :  { %v1297_v59 = vsel %vm1822_vm9, %v1295_v7, -1e+30  ;;  %1602 = vpow2.f32 %v1298_v5 }
 0xc16   :  { %v1300_v8 = vmul.f32 1.442695, %v1297_v59 }
 0xc18   :  { %1604 = vpow2.f32 %v1300_v8 }
 0xc1b   :  { %v1603_v62 = vpop.eup %1602 }
 0xc1e   :  { %v1605_v9 = vpop.eup %1604 }
 0xc1f   :  { %v1302_v10 = vpack.c.bf16 %v1605_v9, %v1603_v62 }
 0xc21   :  { %1480 = vmatmul.msk.bf16.vlgmr.msrb.gmra.mxu3 %vm101_vm2, %v1302_v10 }
 0xc8e   :  { %v1242_v11 = vpop.f32.mrf.mxu3 }
 0xc8f   :  { %1479 = vmatmul.msk.f32.vlgmr.msra.gmra.mxu0 %vm101_vm2, %v1242_v11 }
 0xc97   :  { %1481 = vmatmul.msk.bf16.vlgmr.msrb.gmra.mxu0 %vm101_vm2, %v1302_v10 }
 0xca4   :  { %v1318_v22 = vpop.f32.mrf.mxu3 }
 0xcac   :  { %v1320_v24 = vpop.f32.mrf.mxu3 }
 0xd0c   :  { %v1265_v20 = vpop.f32.mrf.mxu0 }
 0xd0d   :  { %v1268_v13 = vadd.f32 %v1265_v20, %v2025_v32 }
 0xd14   :  { %v1332_v14 = vpop.f32.mrf.mxu0 }
 0xd15   :  { %v1337_v15 = vmax.f32 %v1332_v14, 1e-30 }
 0xd17   :  { %1606 = vrcp.f32 %v1337_v15 }
 0xd1c   :  { %v1334_v16 = vpop.f32.mrf.mxu0 }
 0xd1d   :  { %v1607_v17 = vpop.eup %1606  ;;  %v1338_v18 = vmax.f32 %v1334_v16, 1e-30 }
 0xd1e   :  { %1343 = vperm.xlu2 %1540, %v1607_v17  }
 0xd1f   :  { %1608 = vrcp.f32 %v1338_v18 }
 0xd25   :  { %v1609_v21 = vpop.eup %1608 }
 0xd26   :  { %1348 = vperm.xlu1 %1539, %v1609_v21  }
 0xd78   :  { %v1344_v23 = vpop.permute.xlu2 %1343 }
 0xd79   :  { %v1351_v25 = vmul.f32 %v1344_v23, %v1318_v22 }
 0xd7b   :  { %v1356_v28 = vadd.f32 %v1354_v26, %v1351_v25 }
 0xd7d   :  { %v1358_v30 = vmax.f32 %v1356_v28, 0.0 }
 0xd98   :  { %v1349_v27 = vpop.permute.xlu1 %1348 }
 0xd99   :  { %v1352_v0 = vmul.f32 %v1349_v27, %v1320_v24 }
 0xd9b   :  { %v1357_v57 = vadd.f32 %v1354_v26, %v1352_v0 }
 0xd9d   :  { %v1359_v29 = vmax.f32 %v1357_v57, 0.0 }
 0xd9f   :  { %1374 = vmatpush.msra.mxu1 %v1359_v29 }
 0xda1   :  { %1375 = vmatpush.msra.mxu1 %v1358_v30 }
 0xda2   :  { %1482 = vmatmul.msk.f32.vlgmr.msra.gmra.mxu1 %vm101_vm2, %v1610_v54 }
 0xda3   :  { %1428 = vmatpush.msrb.mxu1 %v1406_v33 }
 0xda5   :  { %1429 = vmatpush.msrb.mxu1 %v1405_v34 }
 0xe1f   :  { %v1377_v32 = vpop.f32.mrf.mxu1 }
 0xe20   :  { %1483 = vmatmul.msk.f32.vlgmr.msra.gmra.mxu2 %vm101_vm2, %v1377_v32 }
 0xea3   :  { %v1400_v36 = vpop.f32.mrf.mxu2 }
 0xea4   :  { %v1403_v37 = vadd.f32 %v1400_v36, %v1268_v13 }
 0xea6   :  { %v1404_v39 = vmax.f32 %v1403_v37, 0.0 }
 0xea8   :  { %1484 = vmatmul.msk.f32.vlgmr.msrb.gmra.mxu1 %vm101_vm2, %v1404_v39 }
 0xf25   :  { %v1431_v42 = vpop.f32.mrf.mxu1 }
 0xf26   :  { %v1432_v43 = vadd.f32 %v1545_v2, %v1431_v42 }
 0xf28   :  { %1435 = vst.msk [vmem:[%s2089_s13] sm:$0x3] %vm1434_vm8, %v1432_v43 }

</bundles_post_ra>
